<compile_context>
chip_gen: v6e
topology: v6e:2x2x1
jax: 0.10.0
libtpu: 0.0.40
codegen_flags: <defaults>
</compile_context>

<pallas_src>
import jax
import jax.numpy as jnp
from jax.experimental import pallas as pl
from jax.experimental.pallas import tpu as pltpu  # noqa: F401


# ------------------------------- sizes --------------------------------------

B = 64                 # batch (forced by x.view(64, -1))
L_IN = 104             # input length (gives 312 flattened features)
C1, K1 = 9, 20         # conv1: Conv1d(1, 9, 20, padding=1)
C2, K2 = 24, 20        # conv2: Conv1d(9, 24, 20, padding=1)
P1_PAD = 45            # conv2 input length incl. its pad=1 (43 + 2)
N1 = C1 * P1_PAAD if False else C1 * P1_PAD   # 405
N1E = N1 + 1           # 406: + "ones" column that carries conv2/fc biases
P2 = 13                # pooled conv2 length
N2 = C2 * P2           # 312  (== fc1 input, already in view(64,-1) order)
N2E = N2 + 1           # 313: + "ones" column that carries the fc bias
N_OUT = 8


# ----------------------------- Pallas kernel --------------------------------

def fused_cnn_kernel(x_ref, m1e_ref, m1o_ref, b1_ref,
                     m2e_ref, m2o_ref, wf_ref, o_ref):
    """Whole SimpleCNN forward for the full 64-row batch, all in VMEM.

    Each conv+relu+maxpool layer is two banded-Toeplitz matmuls (even / odd
    pooling positions) followed by relu(max(even, odd)).  conv2's padding is
    encoded as zero columns/zero bias of layer 1; conv2's bias and the fc bias
    ride on a constant-1 activation column (a1[:, 405] == 1, f[:, 312] == 1).
    """
    x = x_ref[...].astype(jnp.bfloat16)                        # (64, 104)

    # conv1 + relu + maxpool(2) -> (64, 406): padded conv2-input layout + ones
    e1 = jnp.dot(x, m1e_ref[...], preferred_element_type=jnp.float32)
    o1 = jnp.dot(x, m1o_ref[...], preferred_element_type=jnp.float32)
    a1 = jnp.maximum(jnp.maximum(e1, o1) + b1_ref[...], 0.0)
    a1 = a1.astype(jnp.bfloat16)

    # conv2 + relu + maxpool(2) -> (64, 313): view(64,-1) layout + ones column
    # (bias already folded in via a1's ones column, so no separate bias add).
    e2 = jnp.dot(a1, m2e_ref[...], preferred_element_type=jnp.float32)
    o2 = jnp.dot(a1, m2o_ref[...], preferred_element_type=jnp.float32)
    f = jnp.maximum(jnp.maximum(e2, o2), 0.0).astype(jnp.bfloat16)

    # fc1 (bias folded into the last row of wf via f's ones column)
    o_ref[...] = jnp.dot(f, wf_ref[...], preferred_element_type=jnp.float32)


def simple_cnn_forward(x, packed):
    """x: (64, 1, 104) f32 -> (64, 8) f32 (matches the PyTorch forward)."""
    m1e, m1o, beta1, m2e, m2o, wft = packed
    x2d = x.reshape(B, L_IN)
    # Single launch, no grid: every operand is one whole-array VMEM block.
    return pl.pallas_call(
        fused_cnn_kernel,
        out_shape=jax.ShapeDtypeStruct((B, N_OUT), jnp.float32),
    )(x2d, m1e, m1o, beta1, m2e, m2o, wft)


# ------------------- one-time parameter preparation -------------------------

def prepare_params(params):
    """Fold conv weights + zero-padding + pooling-position selection (and the
    conv2/fc biases) into banded Toeplitz matrices.  Computed once, outside
    the per-call path."""
    w1, b1, w2, b2, wf, bf = params

    # --- layer 1 matrices: (104, 406).  Column c*45+l is the *padded*
    #     conv2-input position l (l=0 / l=44 are conv2's zero pad -> zero
    #     columns, zero bias).  Column 405 is all-zero; with beta1[405]=1 it
    #     becomes the constant-1 activation that carries conv2's bias.
    i = jnp.arange(L_IN)[:, None]                       # input position
    col1 = jnp.arange(N1)[None, :]
    c1 = col1 // P1_PAD
    l1 = col1 % P1_PAD
    conv_valid1 = (l1 >= 1) & (l1 <= 43)
    w1m = w1.reshape(C1, K1)

    def make_m1(parity):
        t = 2 * (l1 - 1) + parity                       # raw conv1 output pos
        k = i - t + 1                                   # tap (input pad = 1)
        valid = conv_valid1 & (k >= 0) & (k < K1)
        body = jnp.where(valid, w1m[c1, jnp.clip(k, 0, K1 - 1)], 0.0)  # (104,405)
        ones_maker = jnp.zeros((L_IN, 1), jnp.float32)
        return jnp.concatenate([body, ones_maker], axis=1).astype(jnp.bfloat16)

    beta1 = jnp.concatenate(
        [jnp.where(conv_valid1, b1[c1], 0.0), jnp.ones((1, 1), jnp.float32)],
        axis=1).astype(jnp.float32)                     # (1, 406)

    # --- layer 2 matrices: (406, 313).  Row c*45+l, column d*13+q (flatten
    #     order).  Row 405 (a1's ones column) holds b2 per output column and
    #     a 1 in column 312, which becomes f's constant-1 column for fc bias.
    r = jnp.arange(N1)[:, None]
    col2 = jnp.arange(N2)[None, :]
    rc = r // P1_PAD
    rl = r % P1_PAD
    d = col2 // P2
    q = col2 % P2

    def make_m2(parity):
        k = rl - (2 * q + parity)
        valid = (k >= 0) & (k < K2)
        body = jnp.where(valid, w2[d, rc, jnp.clip(k, 0, K2 - 1)], 0.0)  # (405,312)
        bias_row = b2[d]                                                 # (1,312)
        m = jnp.concatenate([body, bias_row], axis=0)                    # (406,312)
        ones_col = jnp.zeros((N1E, 1), jnp.float32).at[N1, 0].set(1.0)   # (406,1)
        return jnp.concatenate([m, ones_col], axis=1).astype(jnp.bfloat16)

    # --- fc: (313, 8), last row is the bias (hit by f's constant-1 column).
    wft = jnp.concatenate([wf.T, bf.reshape(1, N_OUT)],
                          axis=0).astype(jnp.bfloat16)

    return make_m1(0), make_m1(1), beta1, make_m2(0), make_m2(1), wft


# --------------------------- pure-JAX reference ------------------------------

def reference_forward(x, params):
    w1, b1, w2, b2, wf, bf = params
    dn = ("NCH", "OIH", "NCH")
    hp = jax.lax.Precision.HIGHEST
    y = jax.lax.conv_general_dilated(x, w1, (1,), [(1, 1)],
                                     dimension_numbers=dn, precision=hp)
    y = jax.nn.relu(y + b1[None, :, None])
    y = jax.lax.reduce_window(y, -jnp.inf, jax.lax.max, (1, 1, 2), (1, 1, 2), "VALID")
    y = jax.lax.conv_general_dilated(y, w2, (1,), [(1, 1)],
                                     dimension_numbers=dn, precision=hp)
    y = jax.nn.relu(y + b2[None, :, None])
    y = jax.lax.reduce_window(y, -jnp.inf, jax.lax.max, (1, 1, 2), (1, 1, 2), "VALID")
    y = y.reshape(B, -1)
    return jnp.dot(y, wf.T, precision=hp) + bf


# --------------------------------- main --------------------------------------

if __name__ == "__main__":
    key = jax.random.PRNGKey(0)
    kx, k1, k2, k3, k4, k5, k6 = jax.random.split(key, 7)

    # Deterministic synthetic parameters (shapes per nn.Module __init__).
    w1 = 0.10 * jax.random.normal(k1, (C1, 1, K1), jnp.float32)
    b1 = 0.05 * jax.random.normal(k2, (C1,), jnp.float32)
    w2 = 0.05 * jax.random.normal(k3, (C2, C1, K2), jnp.float32)
    b2 = 0.05 * jax.random.normal(k4, (C2,), jnp.float32)
    wf = 0.05 * jax.random.normal(k5, (N_OUT, N2), jnp.float32)
    bf = 0.05 * jax.random.normal(k6, (N_OUT,), jnp.float32)
    params = (w1, b1, w2, b2, wf, bf)

    # Input: batch is hard-coded to 64 by `x.view(64, -1)`; L=104 yields the
    # 312 flattened features that Linear(312, 8) requires.
    x = jax.random.normal(kx, (B, 1, L_IN), jnp.float32)

    # One-time weight preparation (hoisted out of the per-call path).
    packed = jax.tree_util.tree_map(jax.block_until_ready, prepare_params(params))

    out = jax.block_until_ready(jax.jit(simple_cnn_forward)(x, packed))
    ref = jax.block_until_ready(jax.jit(reference_forward)(x, params))

    assert out.shape == (B, N_OUT), out.shape
    max_diff = float(jnp.max(jnp.abs(out - ref)))
    # bf16 single-pass MXU matmuls (biases now also bf16, routed through the
    # matmul via the ones column) vs f32-HIGHEST reference -> relaxed tol.
    assert max_diff < 3e-2, f"mismatch vs reference: {max_diff}"

    print("KERNEL_OK")
</pallas_src>

<mosaic_0001>
module attributes {stable_mosaic.version = 11 : i64} {
  func.func @fused_cnn_kernel(%arg0: memref<64x104xf32, #tpu.memory_space<vmem>>, %arg1: memref<104x406xbf16, #tpu.memory_space<vmem>>, %arg2: memref<104x406xbf16, #tpu.memory_space<vmem>>, %arg3: memref<1x406xf32, #tpu.memory_space<vmem>>, %arg4: memref<406x313xbf16, #tpu.memory_space<vmem>>, %arg5: memref<406x313xbf16, #tpu.memory_space<vmem>>, %arg6: memref<313x8xbf16, #tpu.memory_space<vmem>>, %arg7: memref<64x8xf32, #tpu.memory_space<vmem>>) attributes {dimension_semantics = [], scalar_prefetch = 0 : i64, scratch_operands = 0 : i64, tpu.core_type = #tpu.core_type<tc>} {
    %c0 = arith.constant 0 : index
    %c0_0 = arith.constant 0 : index
    %0 = vector.load %arg0[%c0, %c0_0] : memref<64x104xf32, #tpu.memory_space<vmem>>, vector<64x104xf32>
    %1 = arith.truncf %0 : vector<64x104xf32> to vector<64x104xbf16>
    %c0_1 = arith.constant 0 : index
    %c0_2 = arith.constant 0 : index
    %2 = vector.load %arg1[%c0_1, %c0_2] : memref<104x406xbf16, #tpu.memory_space<vmem>>, vector<104x406xbf16>
    %cst = arith.constant dense<0.000000e+00> : vector<64x406xf32>
    %3 = tpu.matmul %1, %2, %cst {dimension_numbers = #tpu.dot_dimension_numbers<[1], [0], [0], [1], [0, 0, 1, 1], [], []>} : vector<64x104xbf16>, vector<104x406xbf16>, vector<64x406xf32> -> vector<64x406xf32>
    %c0_3 = arith.constant 0 : index
    %c0_4 = arith.constant 0 : index
    %4 = vector.load %arg2[%c0_3, %c0_4] : memref<104x406xbf16, #tpu.memory_space<vmem>>, vector<104x406xbf16>
    %cst_5 = arith.constant dense<0.000000e+00> : vector<64x406xf32>
    %5 = tpu.matmul %1, %4, %cst_5 {dimension_numbers = #tpu.dot_dimension_numbers<[1], [0], [0], [1], [0, 0, 1, 1], [], []>} : vector<64x104xbf16>, vector<104x406xbf16>, vector<64x406xf32> -> vector<64x406xf32>
    %6 = arith.maximumf %3, %5 : vector<64x406xf32>
    %c0_6 = arith.constant 0 : index
    %c0_7 = arith.constant 0 : index
    %7 = vector.load %arg3[%c0_6, %c0_7] : memref<1x406xf32, #tpu.memory_space<vmem>>, vector<1x406xf32>
    %8 = vector.broadcast %7 : vector<1x406xf32> to vector<64x406xf32>
    %9 = arith.addf %6, %8 : vector<64x406xf32>
    %cst_8 = arith.constant 0.000000e+00 : f32
    %10 = vector.broadcast %cst_8 : f32 to vector<64x406xf32>
    %11 = arith.maximumf %9, %10 : vector<64x406xf32>
    %12 = arith.truncf %11 : vector<64x406xf32> to vector<64x406xbf16>
    %c0_9 = arith.constant 0 : index
    %c0_10 = arith.constant 0 : index
    %13 = vector.load %arg4[%c0_9, %c0_10] : memref<406x313xbf16, #tpu.memory_space<vmem>>, vector<406x313xbf16>
    %cst_11 = arith.constant dense<0.000000e+00> : vector<64x313xf32>
    %14 = tpu.matmul %12, %13, %cst_11 {dimension_numbers = #tpu.dot_dimension_numbers<[1], [0], [0], [1], [0, 0, 1, 1], [], []>} : vector<64x406xbf16>, vector<406x313xbf16>, vector<64x313xf32> -> vector<64x313xf32>
    %c0_12 = arith.constant 0 : index
    %c0_13 = arith.constant 0 : index
    %15 = vector.load %arg5[%c0_12, %c0_13] : memref<406x313xbf16, #tpu.memory_space<vmem>>, vector<406x313xbf16>
    %cst_14 = arith.constant dense<0.000000e+00> : vector<64x313xf32>
    %16 = tpu.matmul %12, %15, %cst_14 {dimension_numbers = #tpu.dot_dimension_numbers<[1], [0], [0], [1], [0, 0, 1, 1], [], []>} : vector<64x406xbf16>, vector<406x313xbf16>, vector<64x313xf32> -> vector<64x313xf32>
    %17 = arith.maximumf %14, %16 : vector<64x313xf32>
    %cst_15 = arith.constant 0.000000e+00 : f32
    %18 = vector.broadcast %cst_15 : f32 to vector<64x313xf32>
    %19 = arith.maximumf %17, %18 : vector<64x313xf32>
    %20 = arith.truncf %19 : vector<64x313xf32> to vector<64x313xbf16>
    %c0_16 = arith.constant 0 : index
    %c0_17 = arith.constant 0 : index
    %21 = vector.load %arg6[%c0_16, %c0_17] : memref<313x8xbf16, #tpu.memory_space<vmem>>, vector<313x8xbf16>
    %cst_18 = arith.constant dense<0.000000e+00> : vector<64x8xf32>
    %22 = tpu.matmul %20, %21, %cst_18 {dimension_numbers = #tpu.dot_dimension_numbers<[1], [0], [0], [1], [0, 0, 1, 1], [], []>} : vector<64x313xbf16>, vector<313x8xbf16>, vector<64x8xf32> -> vector<64x8xf32>
    %c0_19 = arith.constant 0 : index
    %c0_20 = arith.constant 0 : index
    %23 = vector.load %arg7[%c0_19, %c0_20] : memref<64x8xf32, #tpu.memory_space<vmem>>, vector<64x8xf32>
    tpu.vector_store %arg7[%c0_19, %c0_20], %22 {strides = array<i32>} : memref<64x8xf32, #tpu.memory_space<vmem>>, vector<64x8xf32>,
    return
  }
}

</mosaic_0001>

<bundles_post_ra>
// kernel: simple_cnn_forward.1
= control target key start
LH: loop header
LB: loop body
LE: loop exit
PB: predicated region body
PF: predicated region fallthrough
CT: control target
= control target key end

     0   :  { %12 = vsyncpa [#allocation3], 0  ;;  %s3566_s24 = smov [#allocation2]   ;;  %s4502_s0 = inlined_call_operand.vmem [shape: f32[64,104], index: 0, kind: input, shape index: {}]   ;;  %s4503_s1 = inlined_call_operand.vmem [shape: bf16[104,406], index: 1, kind: input, shape index: {}]   ;;  %s4504_s2 = inlined_call_operand.vmem [shape: bf16[104,406], index: 2, kind: input, shape index: {}]   ;;  %s4505_s3 = inlined_call_operand.vmem [shape: f32[1,406], index: 3, kind: input, shape index: {}]   ;;  %s4506_s4 = inlined_call_operand.vmem [shape: bf16[406,313], index: 4, kind: input, shape index: {}]   ;;  %s4507_s5 = inlined_call_operand.hbm [shape: bf16[406,313], index: 5, kind: input, shape index: {}]   ;;  %s4508_s6 = inlined_call_operand.vmem [shape: bf16[313,8], index: 6, kind: input, shape index: {}]   ;;  %s4509_s7 = inlined_call_operand.vmem [shape: f32[64,8], index: 7, kind: output, shape index: {}]  }
   0x1   :  { %s28_s25 = sshll.u32 %s3566_s24, 4  ;;  %s29_s25 = int_to_ptr.vmem [resolvable:$true] %s28_s25 }
   0x2   :  { %s3552_s26 = scalar_lea.vmem %s29_s25, 9792  ;;  %p3557_p1 = scmp.lt.s32.totalorder %s29_s25, %s29_s25 }
   0x3   :  { %p3553_p0 = scmp.ne.s32.totalorder %s29_s25, %s3552_s26  ;;  %p3558_p2 = scmp.lt.s32.totalorder %s3552_s26, %s3552_s26 }
   0x5   :  { %p3559_p3 = por %p3558_p2, %p3557_p1 }
   0x7   :  { %p3560_p4 = pnand %p3559_p3, %p3553_p0 }
   0x9   :  { %3563 = shalt.err (!%p3560_p4)
}
   0xa   :  { %s3567_s27 = smov 192   ;;  %s3568_s28 = smov 12  }
   0xb   :  { %34 = dma.hbm_to_vmem [thread:$0]  %s4507_s5, 9792, %s29_s25, [#allocation3], %s3567_s27, %s3567_s27, %s3568_s28  }
   0xc   :  { %3564 = dma.done.wait [#allocation3], 9792  }
   0xd   :  { %3565 = vsyncadd [#allocation3], 4294957504  ;;  %v3569_v0 = vmov 0   ;;  %v77_v1 = vld [vmem:[%s4503_s1 + $0xc0] sm:$0xff]  ;;  %vm222_vm0 = vcmask 1043456   ;;  %v78_v2 = vld [vmem:[%s4503_s1 + $0xc8] sm:$0xff] }
   0xe   :  { %267 = vmatprep.mubr.bf16.mxu0 %v3569_v0  ;;  %340 = vmatprep.mubr.bf16.mxu1 %v3569_v0  ;;  %v2840_v3 = vcombine.high %v77_v1, %v77_v1  ;;  %v2842_v4 = vcombine.high %v78_v2, %v78_v2  ;;  %v2839_v5 = vcombine.low %v77_v1, %v77_v1  ;;  %v3242_v7 = vld [vmem:[%s4503_s1 + $0xa4] ss:$16 sps:$4 sm:$0xff]   ;;  %v3244_v8 = vld [vmem:[%s4503_s1 + $0xac] ss:$16 sps:$4 sm:$0xff]   ;;  %v3246_v11 = vld [vmem:[%s4503_s1 + $0xa0] ss:$16 sps:$4 sm:$0xff]  }
   0xf   :  { %v2841_v6 = vcombine.low %v78_v2, %v78_v2  ;;  %v3247_v12 = vld [vmem:[%s4503_s1 + $0xa8] ss:$16 sps:$4 sm:$0xff]   ;;  %v3248_v13 = vld [vmem:[%s4503_s1 + $0x84] ss:$16 sps:$4 sm:$0xff]   ;;  %v3250_v14 = vld [vmem:[%s4503_s1 + $0x8c] ss:$16 sps:$4 sm:$0xff]  }
  0x10   :  { %2843 = vmatprep.subr.msk.bf16.mxu0 %vm222_vm0, %v2840_v3  ;;  %2848 = vmatprep.subr.msk.bf16.mxu1 %vm222_vm0, %v2842_v4  ;;  %v224_v9 = vsel %vm222_vm0, %v2839_v5, 0  ;;  %v3252_v15 = vld [vmem:[%s4503_s1 + $0x80] ss:$16 sps:$4 sm:$0xff]   ;;  %v3253_v16 = vld [vmem:[%s4503_s1 + $0x88] ss:$16 sps:$4 sm:$0xff]   ;;  %vm209_vm1 = vcmask 850944  }
  0x11   :  { %v230_v10 = vsel %vm222_vm0, %v2841_v6, 0  ;;  %238 = vmatpush1.bf16.msra.mxu0 %v224_v9  ;;  %v3254_v17 = vld [vmem:[%s4503_s1 + $0x64] ss:$16 sps:$4 sm:$0xff]   ;;  %v3256_v18 = vld [vmem:[%s4503_s1 + $0x6c] ss:$16 sps:$4 sm:$0xff]   ;;  %vm1352_vm2 = vcmask 1042432  }
  0x12   :  { %311 = vmatpush1.bf16.msra.mxu1 %v230_v10  ;;  %239 = vmatprep.subr.bf16.mxu0 %v3242_v7  ;;  %v3258_v19 = vld [vmem:[%s4503_s1 + $0x60] ss:$16 sps:$4 sm:$0xff]   ;;  %v3259_v20 = vld [vmem:[%s4503_s1 + $0x68] ss:$16 sps:$4 sm:$0xff]   ;;  %v3260_v21 = vld [vmem:[%s4503_s1 + $0x44] ss:$16 sps:$4 sm:$0xff]  }
  0x13   :  { %312 = vmatprep.subr.bf16.mxu1 %v3244_v8  ;;  %v3262_v22 = vld [vmem:[%s4503_s1 + $0x4c] ss:$16 sps:$4 sm:$0xff]   ;;  %v3264_v23 = vld [vmem:[%s4503_s1 + $0x40] ss:$16 sps:$4 sm:$0xff]   ;;  %v3265_v24 = vld [vmem:[%s4503_s1 + $0x48] ss:$16 sps:$4 sm:$0xff]  }
  0x14   :  { %v3266_v25 = vld [vmem:[%s4503_s1 + $0x24] ss:$16 sps:$4 sm:$0xff]   ;;  %v3268_v26 = vld [vmem:[%s4503_s1 + $0x2c] ss:$16 sps:$4 sm:$0xff]   ;;  %v3270_v27 = vld [vmem:[%s4503_s1 + $0x20] ss:$16 sps:$4 sm:$0xff]  }
  0x15   :  { %240 = vmatpush1.bf16.msra.mxu0 %v3246_v11  ;;  %v3271_v28 = vld [vmem:[%s4503_s1 + $0x28] ss:$16 sps:$4 sm:$0xff]   ;;  %v3272_v29 = vld [vmem:[%s4503_s1 + $0x4] ss:$16 sps:$4 sm:$0xff]   ;;  %v3274_v30 = vld [vmem:[%s4503_s1 + $0xc] ss:$16 sps:$4 sm:$0xff]  }
  0x16   :  { %313 = vmatpush1.bf16.msra.mxu1 %v3247_v12  ;;  %241 = vmatprep.subr.bf16.mxu0 %v3248_v13  ;;  %v406_v31 = vld [vmem:[%s4504_s2 + $0xc8] sm:$0xff]  ;;  %v3276_v32 = vld [vmem:[%s4503_s1] ss:$16 sps:$4 sm:$0xff]   ;;  %v3287_v46 = vld [vmem:[%s4504_s2 + $0xa4] ss:$16 sps:$4 sm:$0xff]   ;;  %vm1339_vm3 = vcmask 179200  }
  0x17   :  { %314 = vmatprep.subr.bf16.mxu1 %v3250_v14  ;;  %v405_v33 = vld [vmem:[%s4504_s2 + $0xc0] sm:$0xff]  ;;  %v3277_v34 = vld [vmem:[%s4503_s1 + $0x8] ss:$16 sps:$4 sm:$0xff]   ;;  %v2880_v37 = vcombine.high %v406_v31, %v406_v31  ;;  %v2879_v38 = vcombine.low %v406_v31, %v406_v31  ;;  %v3284_v44 = vld [vmem:[%s4504_s2 + $0xac] ss:$16 sps:$4 sm:$0xff]   ;;  %vm2665_vm4 = vcmask 1044480  }
  0x18   :  { %v41_v35 = vld [vmem:[%s4502_s0] sm:$0xff]  ;;  %v42_v36 = vld [vmem:[%s4502_s0 + $0x8] sm:$0xff]  ;;  %v2878_v39 = vcombine.high %v405_v33, %v405_v33  ;;  %v2877_v40 = vcombine.low %v405_v33, %v405_v33  ;;  %v43_v47 = vld [vmem:[%s4502_s0 + $0x10] sm:$0xff]  ;;  %vm2652_vm5 = vcmask 465920   ;;  %vm2801_vm6 = vcmask 64512  }
  0x19   :  { %242 = vmatpush1.bf16.msra.mxu0 %v3252_v15  ;;  %v3710_v41 = vpack.c.bf16 %v42_v36, %v41_v35  ;;  %v544_v42 = vsel %vm222_vm0, %v2879_v38, 0  ;;  %v3282_v45 = vld [vmem:[%s4504_s2 + $0xa8] ss:$16 sps:$4 sm:$0xff]   ;;  %v3285_v49 = vld [vmem:[%s4504_s2 + $0xa0] ss:$16 sps:$4 sm:$0xff]  }
  0x1a   :  { %315 = vmatpush1.bf16.msra.mxu1 %v3253_v16  ;;  %243 = vmatprep.subr.bf16.mxu0 %v3254_v17  ;;  %v538_v43 = vsel %vm222_vm0, %v2877_v40, 0  ;;  %v44_v48 = vld [vmem:[%s4502_s0 + $0x18] sm:$0xff]  ;;  %v3293_v51 = vld [vmem:[%s4504_s2 + $0x84] ss:$16 sps:$4 sm:$0xff]   ;;  %v3291_v54 = vld [vmem:[%s4504_s2 + $0x80] ss:$16 sps:$4 sm:$0xff]  }
  0x1b   :  { %316 = vmatprep.subr.bf16.mxu1 %v3256_v18  ;;  %v3290_v50 = vld [vmem:[%s4504_s2 + $0x8c] ss:$16 sps:$4 sm:$0xff]   ;;  %v3746_v52 = vpack.c.bf16 %v44_v48, %v43_v47  ;;  %v3288_v53 = vld [vmem:[%s4504_s2 + $0x88] ss:$16 sps:$4 sm:$0xff]   ;;  %v45_v57 = vld [vmem:[%s4502_s0 + $0x20] sm:$0xff] }
  0x1c   :  { %v3296_v55 = vld [vmem:[%s4504_s2 + $0x6c] ss:$16 sps:$4 sm:$0xff]   ;;  %v3294_v56 = vld [vmem:[%s4504_s2 + $0x68] ss:$16 sps:$4 sm:$0xff]   ;;  %v3299_v58 = vld [vmem:[%s4504_s2 + $0x64] ss:$16 sps:$4 sm:$0xff]  }
  0x1d   :  { %244 = vmatpush1.bf16.msra.mxu0 %v3258_v19  ;;  %v46_v59 = vld [vmem:[%s4502_s0 + $0x28] sm:$0xff]  ;;  %v3297_v60 = vld [vmem:[%s4504_s2 + $0x60] ss:$16 sps:$4 sm:$0xff]   ;;  %v3305_v62 = vld [vmem:[%s4504_s2 + $0x44] ss:$16 sps:$4 sm:$0xff]  }
  0x1e   :  { %317 = vmatpush1.bf16.msra.mxu1 %v3259_v20  ;;  %245 = vmatprep.subr.bf16.mxu0 %v3260_v21  ;;  %v3302_v61 = vld [vmem:[%s4504_s2 + $0x4c] ss:$16 sps:$4 sm:$0xff]   ;;  %v3300_v63 = vld [vmem:[%s4504_s2 + $0x48] ss:$16 sps:$4 sm:$0xff]   ;;  %v3303_v1 = vld [vmem:[%s4504_s2 + $0x40] ss:$16 sps:$4 sm:$0xff]   ;;  %v51_v2 = vpack.c.bf16 %v46_v59, %v45_v57 }
  0x1f   :  { %318 = vmatprep.subr.bf16.mxu1 %v3262_v22  ;;  %v3308_v3 = vld [vmem:[%s4504_s2 + $0x2c] ss:$16 sps:$4 sm:$0xff]   ;;  %v3311_v4 = vld [vmem:[%s4504_s2 + $0x24] ss:$16 sps:$4 sm:$0xff]   ;;  %v3306_v5 = vld [vmem:[%s4504_s2 + $0x28] ss:$16 sps:$4 sm:$0xff]  }
  0x20   :  { %v47_v6 = vld [vmem:[%s4502_s0 + $0x30] sm:$0xff]  ;;  %v48_v7 = vld [vmem:[%s4502_s0 + $0x38] sm:$0xff]  ;;  %v3327_v21 = vld [vmem:[%s4506_s4 + $0x60] ss:$12 sps:$4 sm:$0xff]  }
  0x21   :  { %246 = vmatpush1.bf16.msra.mxu0 %v3264_v23  ;;  %v3309_v8 = vld [vmem:[%s4504_s2 + $0x20] ss:$16 sps:$4 sm:$0xff]   ;;  %v3314_v9 = vld [vmem:[%s4504_s2 + $0x4] ss:$16 sps:$4 sm:$0xff]   ;;  %v3317_v10 = vld [vmem:[%s4504_s2 + $0xc] ss:$16 sps:$4 sm:$0xff]   ;;  %v52_v13 = vpack.c.bf16 %v48_v7, %v47_v6 }
  0x22   :  { %319 = vmatpush1.bf16.msra.mxu1 %v3265_v24  ;;  %247 = vmatprep.subr.bf16.mxu0 %v3266_v25  ;;  %v3312_v11 = vld [vmem:[%s4504_s2] ss:$16 sps:$4 sm:$0xff]   ;;  %v3315_v12 = vld [vmem:[%s4504_s2 + $0x8] ss:$16 sps:$4 sm:$0xff]  }
  0x23   :  { %320 = vmatprep.subr.bf16.mxu1 %v3268_v26  ;;  %v3320_v14 = vld [vmem:[%s4506_s4 + $0xac] ss:$12 sps:$4 sm:$0xff]   ;;  %v3318_v15 = vld [vmem:[%s4506_s4 + $0xa8] ss:$12 sps:$4 sm:$0xff]   ;;  %v3321_v17 = vld [vmem:[%s4506_s4 + $0x90] ss:$12 sps:$4 sm:$0xff]  }
  0x24   :  { %v3323_v16 = vld [vmem:[%s4506_s4 + $0x94] ss:$12 sps:$4 sm:$0xff]   ;;  %v3326_v18 = vld [vmem:[%s4506_s4 + $0x7c] ss:$12 sps:$4 sm:$0xff]   ;;  %v3324_v19 = vld [vmem:[%s4506_s4 + $0x78] ss:$12 sps:$4 sm:$0xff]  }
  0x25   :  { %248 = vmatpush1.bf16.msra.mxu0 %v3270_v27  ;;  %v3329_v20 = vld [vmem:[%s4506_s4 + $0x64] ss:$12 sps:$4 sm:$0xff]   ;;  %v3332_v22 = vld [vmem:[%s4506_s4 + $0x4c] ss:$12 sps:$4 sm:$0xff]   ;;  %v3330_v23 = vld [vmem:[%s4506_s4 + $0x48] ss:$12 sps:$4 sm:$0xff]  }
  0x26   :  { %321 = vmatpush1.bf16.msra.mxu1 %v3271_v28  ;;  %249 = vmatprep.subr.bf16.mxu0 %v3272_v29  ;;  %v3335_v24 = vld [vmem:[%s4506_s4 + $0x34] ss:$12 sps:$4 sm:$0xff]   ;;  %v3333_v25 = vld [vmem:[%s4506_s4 + $0x30] ss:$12 sps:$4 sm:$0xff]   ;;  %v3341_v27 = vld [vmem:[%s4506_s4 + $0x22c] ss:$12 sps:$4 sm:$0xff]  }
  0x27   :  { %322 = vmatprep.subr.bf16.mxu1 %v3274_v30  ;;  %v3338_v26 = vld [vmem:[%s4506_s4 + $0x1c] ss:$12 sps:$4 sm:$0xff]   ;;  %v3336_v28 = vld [vmem:[%s4506_s4 + $0x18] ss:$12 sps:$4 sm:$0xff]   ;;  %v3347_v31 = vld [vmem:[%s4506_s4 + $0x214] ss:$12 sps:$4 sm:$0xff]  }
  0x28   :  { %v3339_v29 = vld [vmem:[%s4506_s4 + $0x228] ss:$12 sps:$4 sm:$0xff]   ;;  %v3344_v30 = vld [vmem:[%s4506_s4 + $0x4] ss:$12 sps:$4 sm:$0xff]   ;;  %v3366_v48 = vld [vmem:[%s4506_s4 + $0x120] ss:$12 sps:$4 sm:$0xff]  }
  0x29   :  { %250 = vmatpush1.bf16.msra.mxu0 %v3276_v32  ;;  %v3342_v32 = vld [vmem:[%s4506_s4] ss:$12 sps:$4 sm:$0xff]   ;;  %v3345_v33 = vld [vmem:[%s4506_s4 + $0x210] ss:$12 sps:$4 sm:$0xff]   ;;  %v3348_v36 = vld [vmem:[%s4506_s4 + $0x168] ss:$12 sps:$4 sm:$0xff]  }
  0x2a   :  { %323 = vmatpush1.bf16.msra.mxu1 %v3277_v34  ;;  %2881 = vmatprep.subr.msk.bf16.mxu0 %vm222_vm0, %v2878_v39  ;;  %v3350_v34 = vld [vmem:[%s4506_s4 + $0x16c] ss:$12 sps:$4 sm:$0xff]   ;;  %v3353_v35 = vld [vmem:[%s4506_s4 + $0x1fc] ss:$12 sps:$4 sm:$0xff]   ;;  %v3356_v38 = vld [vmem:[%s4506_s4 + $0x154] ss:$12 sps:$4 sm:$0xff]  }
  0x2b   :  { %2886 = vmatprep.subr.msk.bf16.mxu1 %vm222_vm0, %v2880_v37  ;;  %v3351_v37 = vld [vmem:[%s4506_s4 + $0x1f8] ss:$12 sps:$4 sm:$0xff]   ;;  %v3354_v40 = vld [vmem:[%s4506_s4 + $0x150] ss:$12 sps:$4 sm:$0xff]   ;;  %v3371_v47 = vld [vmem:[%s4506_s4 + $0x1b4] ss:$12 sps:$4 sm:$0xff]  }
  0x2c   :  { %2844 = vmatmul.mubr.msk.bf16.vlgmr.msra.gmra.mxu0 %vm209_vm1, %v3710_v41  ;;  %v3359_v39 = vld [vmem:[%s4506_s4 + $0x1e4] ss:$12 sps:$4 sm:$0xff]   ;;  %v3381_v57 = vld [vmem:[%s4506_s4 + $0x180] ss:$12 sps:$4 sm:$0xff]   ;;  %v3386_v59 = vld [vmem:[%s4506_s4 + $0xdc] ss:$12 sps:$4 sm:$0xff]  }
  0x2d   :  { %2849 = vmatmul.mubr.msk.bf16.vlgmr.msra.gmra.mxu1 %vm209_vm1, %v3710_v41  ;;  %552 = vmatpush1.bf16.msra.mxu0 %v538_v43  ;;  %v3365_v43 = vld [vmem:[%s4506_s4 + $0x1cc] ss:$12 sps:$4 sm:$0xff]  }
  0x2e   :  { %625 = vmatpush1.bf16.msra.mxu1 %v544_v42  ;;  %277 = vmatprep.mubr.bf16.mxu0 %v3569_v0  ;;  %v3362_v42 = vld [vmem:[%s4506_s4 + $0x13c] ss:$12 sps:$4 sm:$0xff]  }
  0x2f   :  { %626 = vmatprep.subr.bf16.mxu1 %v3284_v44  ;;  %350 = vmatprep.mubr.bf16.mxu1 %v3569_v0  ;;  %v3360_v44 = vld [vmem:[%s4506_s4 + $0x138] ss:$12 sps:$4 sm:$0xff]  }
  0x30   :  { %553 = vmatprep.subr.bf16.mxu0 %v3287_v46  ;;  %v3368_v46 = vld [vmem:[%s4506_s4 + $0x124] ss:$12 sps:$4 sm:$0xff]  }
  0x31   :  { %554 = vmatpush1.bf16.msra.mxu0 %v3285_v49  ;;  %v3369_v49 = vld [vmem:[%s4506_s4 + $0x1b0] ss:$12 sps:$4 sm:$0xff]  }
  0x32   :  { %627 = vmatpush1.bf16.msra.mxu1 %v3282_v45  ;;  %555 = vmatprep.subr.bf16.mxu0 %v3293_v51  ;;  %v3363_v45 = vld [vmem:[%s4506_s4 + $0x1c8] ss:$12 sps:$4 sm:$0xff]  }
  0x33   :  { %628 = vmatprep.subr.bf16.mxu1 %v3290_v50  ;;  %v3374_v50 = vld [vmem:[%s4506_s4 + $0x10c] ss:$12 sps:$4 sm:$0xff]   ;;  %v3377_v51 = vld [vmem:[%s4506_s4 + $0x19c] ss:$12 sps:$4 sm:$0xff]  }
  0x34   :  { %2845 = vmatmul.mubr.msk.bf16.gmra.mxu0 %vm209_vm1, %v3746_v52 }
  0x35   :  { %2850 = vmatmul.mubr.msk.bf16.gmra.mxu1 %vm209_vm1, %v3746_v52  ;;  %556 = vmatpush1.bf16.msra.mxu0 %v3291_v54  ;;  %v3380_v54 = vld [vmem:[%s4506_s4 + $0xf4] ss:$12 sps:$4 sm:$0xff]  }
  0x36   :  { %629 = vmatpush1.bf16.msra.mxu1 %v3288_v53  ;;  %287 = vmatprep.mubr.bf16.mxu0 %v3569_v0  ;;  %v3375_v53 = vld [vmem:[%s4506_s4 + $0x198] ss:$12 sps:$4 sm:$0xff]  }
  0x37   :  { %630 = vmatprep.subr.bf16.mxu1 %v3296_v55  ;;  %360 = vmatprep.mubr.bf16.mxu1 %v3569_v0  ;;  %v3383_v55 = vld [vmem:[%s4506_s4 + $0x184] ss:$12 sps:$4 sm:$0xff]  }
  0x38   :  { %557 = vmatprep.subr.bf16.mxu0 %v3299_v58  ;;  %v929_v58 = vld [vmem:[%s4506_s4 + $0x258] sm:$0x77] }
  0x39   :  { %558 = vmatpush1.bf16.msra.mxu0 %v3297_v60  ;;  %v2967_v60 = vcombine.high %v929_v58, %v929_v58 }
  0x3a   :  { %631 = vmatpush1.bf16.msra.mxu1 %v3294_v56  ;;  %559 = vmatprep.subr.bf16.mxu0 %v3305_v62  ;;  %v3378_v56 = vld [vmem:[%s4506_s4 + $0xf0] ss:$12 sps:$4 sm:$0xff]   ;;  %v3384_v62 = vld [vmem:[%s4506_s4 + $0xd8] ss:$12 sps:$4 sm:$0xff]  }
  0x3b   :  { %632 = vmatprep.subr.bf16.mxu1 %v3302_v61  ;;  %v2966_v61 = vcombine.low %v929_v58, %v929_v58 }
  0x3c   :  { %2846 = vmatmul.mubr.msk.bf16.gmra.mxu0 %vm209_vm1, %v51_v2 }
  0x3d   :  { %2851 = vmatmul.mubr.msk.bf16.gmra.mxu1 %vm209_vm1, %v51_v2  ;;  %560 = vmatpush1.bf16.msra.mxu0 %v3303_v1  ;;  %v3391_v1 = vld [vmem:[%s4506_s4 + $0xc4] ss:$12 sps:$4 sm:$0xff]  }
  0x3e   :  { %633 = vmatpush1.bf16.msra.mxu1 %v3300_v63  ;;  %297 = vmatprep.mubr.bf16.mxu0 %v3569_v0  ;;  %v1354_v63 = vsel %vm1352_vm2, %v2966_v61, 0 }
  0x3f   :  { %370 = vmatprep.mubr.bf16.mxu1 %v3569_v0  ;;  %634 = vmatprep.subr.bf16.mxu1 %v3308_v3  ;;  %v3389_v3 = vld [vmem:[%s4506_s4 + $0xc0] ss:$12 sps:$4 sm:$0xff]  }
  0x40   :  { %561 = vmatprep.subr.bf16.mxu0 %v3311_v4  ;;  %v3392_v4 = vld [vmem:[%s4506_s4 + $0x240] ss:$12 sps:$4 sm:$0xff]  }
  0x41   :  { %562 = vmatpush1.bf16.msra.mxu0 %v3309_v8 }
  0x42   :  { %635 = vmatpush1.bf16.msra.mxu1 %v3306_v5  ;;  %563 = vmatprep.subr.bf16.mxu0 %v3314_v9  ;;  %v3395_v5 = vld [vmem:[%s4506_s4 + $0x170] ss:$12 sps:$4 sm:$0xff]  }
  0x43   :  { %636 = vmatprep.subr.bf16.mxu1 %v3317_v10 }
  0x44   :  { %2847 = vmatmul.mubr.msk.bf16.gmra.mxu0 %vm209_vm1, %v52_v13 }
  0x45   :  { %2852 = vmatmul.mubr.msk.bf16.gmra.mxu1 %vm209_vm1, %v52_v13  ;;  %564 = vmatpush1.bf16.msra.mxu0 %v3312_v11 }
  0x46   :  { %637 = vmatpush1.bf16.msra.mxu1 %v3315_v12  ;;  %581 = vmatprep.mubr.bf16.mxu0 %v3569_v0 }
  0x47   :  { %654 = vmatprep.mubr.bf16.mxu1 %v3569_v0  ;;  %1362 = vmatprep.subr.bf16.mxu0 %v3320_v14 }
  0x48   :  { %1435 = vmatprep.subr.bf16.mxu1 %v3341_v27 }
  0x4c   :  { %2882 = vmatmul.mubr.msk.bf16.vlgmr.msra.gmra.mxu0 %vm209_vm1, %v3710_v41 }
  0x4d   :  { %2887 = vmatmul.mubr.msk.bf16.vlgmr.msra.gmra.mxu1 %vm209_vm1, %v3710_v41  ;;  %591 = vmatprep.mubr.bf16.mxu0 %v3569_v0  ;;  %v3357_v41 = vld [vmem:[%s4506_s4 + $0x1e0] ss:$12 sps:$4 sm:$0xff]  }
  0x4e   :  { %664 = vmatprep.mubr.bf16.mxu1 %v3569_v0  ;;  %1363 = vmatpush1.bf16.msra.mxu0 %v3318_v15 }
  0x4f   :  { %1364 = vmatprep.subr.bf16.mxu0 %v3323_v16  ;;  %1436 = vmatpush1.bf16.msra.mxu1 %v3339_v29 }
  0x50   :  { %1437 = vmatprep.subr.bf16.mxu1 %v3347_v31 }
  0x52   :  { %1365 = vmatpush1.bf16.msra.mxu0 %v3321_v17 }
  0x53   :  { %1366 = vmatprep.subr.bf16.mxu0 %v3326_v18  ;;  %1438 = vmatpush1.bf16.msra.mxu1 %v3345_v33 }
  0x54   :  { %2883 = vmatmul.mubr.msk.bf16.gmra.mxu0 %vm209_vm1, %v3746_v52  ;;  %1439 = vmatprep.subr.bf16.mxu1 %v3353_v35 }
  0x55   :  { %2888 = vmatmul.mubr.msk.bf16.gmra.mxu1 %vm209_vm1, %v3746_v52  ;;  %601 = vmatprep.mubr.bf16.mxu0 %v3569_v0  ;;  %v3372_v52 = vld [vmem:[%s4506_s4 + $0x108] ss:$12 sps:$4 sm:$0xff]  }
  0x56   :  { %674 = vmatprep.mubr.bf16.mxu1 %v3569_v0  ;;  %1367 = vmatpush1.bf16.msra.mxu0 %v3324_v19 }
  0x57   :  { %1368 = vmatprep.subr.bf16.mxu0 %v3329_v20  ;;  %1440 = vmatpush1.bf16.msra.mxu1 %v3351_v37 }
  0x58   :  { %1441 = vmatprep.subr.bf16.mxu1 %v3359_v39 }
  0x5a   :  { %1369 = vmatpush1.bf16.msra.mxu0 %v3327_v21 }
  0x5b   :  { %1370 = vmatprep.subr.bf16.mxu0 %v3332_v22  ;;  %1442 = vmatpush1.bf16.msra.mxu1 %v3357_v41  ;;  %v727_v41 = vld [vmem:[%s4505_s3] sm:$0xf] }
  0x5c   :  { %2884 = vmatmul.mubr.msk.bf16.gmra.mxu0 %vm209_vm1, %v51_v2  ;;  %1443 = vmatprep.subr.bf16.mxu1 %v3365_v43 }
  0x5d   :  { %2889 = vmatmul.mubr.msk.bf16.gmra.mxu1 %vm209_vm1, %v51_v2  ;;  %611 = vmatprep.mubr.bf16.mxu0 %v3569_v0  ;;  %v3394_v2 = vld [vmem:[%s4506_s4 + $0x244] ss:$12 sps:$4 sm:$0xff]  }
  0x5e   :  { %684 = vmatprep.mubr.bf16.mxu1 %v3569_v0  ;;  %1371 = vmatpush1.bf16.msra.mxu0 %v3330_v23 }
  0x5f   :  { %1372 = vmatprep.subr.bf16.mxu0 %v3335_v24  ;;  %1444 = vmatpush1.bf16.msra.mxu1 %v3363_v45 }
  0x60   :  { %1445 = vmatprep.subr.bf16.mxu1 %v3371_v47 }
  0x62   :  { %1373 = vmatpush1.bf16.msra.mxu0 %v3333_v25 }
  0x63   :  { %1374 = vmatprep.subr.bf16.mxu0 %v3338_v26  ;;  %1446 = vmatpush1.bf16.msra.mxu1 %v3369_v49 }
  0x64   :  { %2885 = vmatmul.mubr.msk.bf16.gmra.mxu0 %vm209_vm1, %v52_v13  ;;  %1447 = vmatprep.subr.bf16.mxu1 %v3377_v51 }
  0x65   :  { %2890 = vmatmul.mubr.msk.bf16.gmra.mxu1 %vm209_vm1, %v52_v13 }
  0x66   :  { %1375 = vmatpush1.bf16.msra.mxu0 %v3336_v28 }
  0x67   :  { %1376 = vmatprep.subr.bf16.mxu0 %v3344_v30  ;;  %1448 = vmatpush1.bf16.msra.mxu1 %v3375_v53  ;;  %v729_v30 = vlaneseq }
  0x68   :  { %1449 = vmatprep.subr.bf16.mxu1 %v3383_v55 }
  0x69   :  { %v730_v35 = vshrl.u32 %v729_v30, 7 }
  0x6a   :  { %1377 = vmatpush1.bf16.msra.mxu0 %v3342_v32 }
  0x6b   :  { %1378 = vmatprep.subr.bf16.mxu0 %v3350_v34  ;;  %1450 = vmatpush1.bf16.msra.mxu1 %v3381_v57  ;;  %v743_v43 = vsub.s32 3, %v730_v35 }
  0x6c   :  { %2969 = vmatprep.subr.msk.bf16.mxu1 %vm1352_vm2, %v2967_v60 }
  0x6e   :  { %1379 = vmatpush2.bf16.msra.mxu0 %v3348_v36 }
  0x6f   :  { %1380 = vmatprep.subr.bf16.mxu0 %v3356_v38  ;;  %1464 = vmatpush2.bf16.msra.mxu1 %v1354_v63 }
  0x70   :  { %1465 = vmatprep.subr.bf16.mxu1 %v3394_v2 }
  0x72   :  { %1381 = vmatpush2.bf16.msra.mxu0 %v3354_v40  ;;  %v731_v40 = vsub.s32 0, %v730_v35 }
  0x73   :  { %1382 = vmatprep.subr.bf16.mxu0 %v3362_v42  ;;  %1466 = vmatpush2.bf16.msra.mxu1 %v3392_v4  ;;  %v735_v42 = vsub.s32 1, %v730_v35 }
  0x74   :  { %3089 = vmatprep.subr.bf16.mxu1 %v3395_v5 }
  0x76   :  { %1383 = vmatpush2.bf16.msra.mxu0 %v3360_v44 }
  0x77   :  { %1384 = vmatprep.subr.bf16.mxu0 %v3368_v46  ;;  %v739_v46 = vsub.s32 2, %v730_v35 }
  0x7a   :  { %1385 = vmatpush2.bf16.msra.mxu0 %v3366_v48  ;;  %v4056_v48 = vrot.slane %v727_v41, %v731_v40 }
  0x7b   :  { %1386 = vmatprep.subr.bf16.mxu0 %v3374_v50 }
  0x7e   :  { %1387 = vmatpush2.bf16.msra.mxu0 %v3372_v52  ;;  %v4058_v52 = vrot.slane %v727_v41, %v735_v42 }
  0x7f   :  { %1388 = vmatprep.subr.bf16.mxu0 %v3380_v54  ;;  %v4060_v54 = vrot.slane %v727_v41, %v743_v43 }
  0x82   :  { %1389 = vmatpush2.bf16.msra.mxu0 %v3378_v56  ;;  %v4062_v56 = vrot.slane %v727_v41, %v739_v46 }
  0x83   :  { %1390 = vmatprep.subr.bf16.mxu0 %v3386_v59 }
  0x86   :  { %1391 = vmatpush2.bf16.msra.mxu0 %v3384_v62 }
  0x87   :  { %1392 = vmatprep.subr.bf16.mxu0 %v3391_v1 }
  0x8a   :  { %1393 = vmatpush2.bf16.msra.mxu0 %v3389_v3 }
  0x8b   :  { %1573 = vmatprep.subr.bf16.mxu0 %v3569_v0 }
  0xec   :  { %v269_v6 = vpop.f32.mrf.mxu0 }
  0xed   :  { %v342_v7 = vpop.f32.mrf.mxu1 }
  0xee   :  { %v271_v8 = vpop.f32.mrf.mxu0 }
  0xef   :  { %v344_v9 = vpop.f32.mrf.mxu1 }
  0xf0   :  { %v273_v10 = vpop.f32.mrf.mxu0 }
  0xf1   :  { %v346_v11 = vpop.f32.mrf.mxu1 }
  0xf2   :  { %v275_v12 = vpop.f32.mrf.mxu0 }
  0xf3   :  { %v348_v13 = vpop.f32.mrf.mxu1 }
  0xf4   :  { %v4005_v14 = vpop.f32.mrf.mxu0 }
  0xf5   :  { %v4007_v15 = vpop.f32.mrf.mxu1 }
  0xf6   :  { %v4009_v16 = vpop.f32.mrf.mxu0 }
  0xf7   :  { %v4011_v17 = vpop.f32.mrf.mxu1 }
  0xf8   :  { %v4013_v18 = vpop.f32.mrf.mxu0 }
  0xf9   :  { %v4015_v19 = vpop.f32.mrf.mxu1 }
  0xfa   :  { %v4017_v20 = vpop.f32.mrf.mxu0 }
  0xfb   :  { %v4019_v21 = vpop.f32.mrf.mxu1 }
  0xfc   :  { %v4021_v22 = vpop.f32.mrf.mxu0 }
  0xfd   :  { %v4023_v23 = vpop.f32.mrf.mxu1 }
  0xfe   :  { %v4025_v24 = vpop.f32.mrf.mxu0 }
  0xff   :  { %v4027_v25 = vpop.f32.mrf.mxu1 }
 0x100   :  { %v4029_v26 = vpop.f32.mrf.mxu0 }
 0x101   :  { %v4031_v27 = vpop.f32.mrf.mxu1 }
 0x102   :  { %v4033_v28 = vpop.f32.mrf.mxu0 }
 0x103   :  { %v4035_v29 = vpop.f32.mrf.mxu1 }
 0x104   :  { %v4037_v31 = vpop.f32.mrf.mxu0 }
 0x105   :  { %v4039_v32 = vpop.f32.mrf.mxu1 }
 0x106   :  { %v4041_v33 = vpop.f32.mrf.mxu0 }
 0x107   :  { %v4043_v34 = vpop.f32.mrf.mxu1 }
 0x108   :  { %v4045_v36 = vpop.f32.mrf.mxu0 }
 0x109   :  { %v4047_v37 = vpop.f32.mrf.mxu1 }
 0x10a   :  { %v4049_v38 = vpop.f32.mrf.mxu0 }
 0x10b   :  { %v4051_v39 = vpop.f32.mrf.mxu1 }
 0x10c   :  { %v583_v44 = vpop.f32.mrf.mxu0 }
 0x10d   :  { %v656_v45 = vpop.f32.mrf.mxu1  ;;  %v695_v47 = vmax.f32 %v269_v6, %v583_v44 }
 0x10e   :  { %v585_v49 = vpop.f32.mrf.mxu0  ;;  %v697_v55 = vmax.f32 %v342_v7, %v656_v45 }
 0x10f   :  { %v658_v50 = vpop.f32.mrf.mxu1  ;;  %v696_v51 = vmax.f32 %v271_v8, %v585_v49  ;;  %v749_v59 = vadd.f32 %v4056_v48, %v695_v47 }
 0x110   :  { %v698_v53 = vmax.f32 %v344_v9, %v658_v50  ;;  %v587_v57 = vpop.f32.mrf.mxu0  ;;  %v751_v5 = vadd.f32 %v4062_v56, %v697_v55 }
 0x111   :  { %v660_v58 = vpop.f32.mrf.mxu1  ;;  %v699_v60 = vmax.f32 %v273_v10, %v587_v57  ;;  %v750_v1 = vadd.f32 %v4058_v52, %v696_v51  ;;  %v781_v35 = vmax.f32 %v749_v59, 0.0  ;;  %v3396_v59 = vld [vmem:[%s4506_s4 + $0xb0] ss:$12 sps:$4 sm:$0xff]  }
 0x112   :  { %v701_v61 = vmax.f32 %v346_v11, %v660_v58  ;;  %v589_v62 = vpop.f32.mrf.mxu0  ;;  %v752_v2 = vadd.f32 %v4060_v54, %v698_v53  ;;  %v783_v46 = vmax.f32 %v751_v5, 0.0 }
 0x113   :  { %v662_v63 = vpop.f32.mrf.mxu1  ;;  %v700_v3 = vmax.f32 %v275_v12, %v589_v62  ;;  %v753_v6 = vadd.f32 %v4056_v48, %v699_v60 }
 0x114   :  { %v702_v4 = vmax.f32 %v348_v13, %v662_v63  ;;  %v755_v7 = vadd.f32 %v4062_v56, %v701_v61  ;;  %v593_v8 = vpop.f32.mrf.mxu0  ;;  %v782_v13 = vmax.f32 %v750_v1, 0.0  ;;  %v784_v43 = vmax.f32 %v752_v2, 0.0  ;;  %v3397_v63 = vld [vmem:[%s4506_s4 + $0x230] ss:$12 sps:$4 sm:$0xff]   ;;  %v3398_v1 = vld [vmem:[%s4506_s4 + $0x158] ss:$12 sps:$4 sm:$0xff]  }
 0x115   :  { %v666_v9 = vpop.f32.mrf.mxu1  ;;  %v754_v30 = vadd.f32 %v4058_v52, %v700_v3  ;;  %v703_v11 = vmax.f32 %v4005_v14, %v593_v8  ;;  %v785_v40 = vmax.f32 %v753_v6, 0.0 }
 0x116   :  { %v756_v10 = vadd.f32 %v4060_v54, %v702_v4  ;;  %v787_v41 = vmax.f32 %v755_v7, 0.0  ;;  %v595_v42 = vpop.f32.mrf.mxu0  ;;  %v705_v47 = vmax.f32 %v4007_v15, %v666_v9 }
 0x117   :  { %v668_v12 = vpop.f32.mrf.mxu1  ;;  %v786_v44 = vmax.f32 %v754_v30, 0.0  ;;  %v704_v49 = vmax.f32 %v4009_v16, %v595_v42  ;;  %v4076_v14 = vpack.c.bf16 %v785_v40, %v781_v35  ;;  %v757_v58 = vadd.f32 %v4056_v48, %v703_v11  ;;  %v3399_v30 = vld [vmem:[%s4506_s4 + $0x98] ss:$12 sps:$4 sm:$0xff]  }
 0x118   :  { %v788_v45 = vmax.f32 %v756_v10, 0.0  ;;  %v706_v50 = vmax.f32 %v4011_v17, %v668_v12  ;;  %v597_v51 = vpop.f32.mrf.mxu0  ;;  %v4086_v60 = vpack.c.bf16 %v787_v41, %v783_v46  ;;  %v3400_v41 = vld [vmem:[%s4506_s4 + $0x218] ss:$12 sps:$4 sm:$0xff]  }
 0x119   :  { %v670_v53 = vpop.f32.mrf.mxu1  ;;  %v4078_v55 = vpack.c.bf16 %v786_v44, %v782_v13  ;;  %v758_v15 = vadd.f32 %v4058_v52, %v704_v49  ;;  %v707_v16 = vmax.f32 %v4013_v18, %v597_v51  ;;  %v759_v18 = vadd.f32 %v4062_v56, %v705_v47  ;;  %v3401_v49 = vld [vmem:[%s4506_s4 + $0x140] ss:$12 sps:$4 sm:$0xff]  }
 0x11a   :  { %v4080_v57 = vpack.c.bf16 %v788_v45, %v784_v43  ;;  %v709_v17 = vmax.f32 %v4015_v19, %v670_v53  ;;  %v599_v61 = vpop.f32.mrf.mxu0  ;;  %v760_v2 = vadd.f32 %v4060_v54, %v706_v50  ;;  %v789_v10 = vmax.f32 %v757_v58, 0.0 }
 0x11b   :  { %v672_v62 = vpop.f32.mrf.mxu1  ;;  %v708_v3 = vmax.f32 %v4017_v20, %v599_v61  ;;  %1394 = vmatprep.mubr.bf16.mxu0 %v4078_v55  ;;  %v761_v19 = vadd.f32 %v4056_v48, %v707_v16  ;;  %v790_v42 = vmax.f32 %v758_v15, 0.0  ;;  %v3403_v61 = vld [vmem:[%s4506_s4 + $0x200] ss:$12 sps:$4 sm:$0xff]  }
 0x11c   :  { %v710_v4 = vmax.f32 %v4019_v21, %v672_v62  ;;  %2970 = vmatprep.mubr.msk.bf16.mxu1 %vm1339_vm3, %v4080_v57  ;;  %v763_v5 = vadd.f32 %v4062_v56, %v709_v17  ;;  %v603_v6 = vpop.f32.mrf.mxu0  ;;  %1395 = vmatmul.mubr.bf16.vlgmr.msra.gmra.mxu0 %v4076_v14  ;;  %v792_v12 = vmax.f32 %v760_v2, 0.0 }
 0x11d   :  { %v676_v7 = vpop.f32.mrf.mxu1  ;;  %1468 = vmatmul.mubr.bf16.vlgmr.msra.gmra.mxu1 %v4086_v60  ;;  %v762_v20 = vadd.f32 %v4058_v52, %v708_v3  ;;  %v711_v8 = vmax.f32 %v4021_v22, %v603_v6  ;;  %v793_v11 = vmax.f32 %v761_v19, 0.0  ;;  %1574 = vmatpush1.bf16.msra.mxu0 %v3397_v63 }
 0x11e   :  { %v764_v21 = vadd.f32 %v4060_v54, %v710_v4  ;;  %v713_v9 = vmax.f32 %v4023_v23, %v676_v7  ;;  %3090 = vmatpush3.bf16.msra.mxu1 %v3396_v59  ;;  %v605_v35 = vpop.f32.mrf.mxu0  ;;  %1575 = vmatprep.subr.bf16.mxu0 %v3569_v0  ;;  %v791_v23 = vmax.f32 %v759_v18, 0.0  ;;  %v795_v43 = vmax.f32 %v763_v5, 0.0  ;;  %v3404_v4 = vld [vmem:[%s4506_s4 + $0x128] ss:$12 sps:$4 sm:$0xff]  }
 0x11f   :  { %v678_v40 = vpop.f32.mrf.mxu1  ;;  %3091 = vmatprep.subr.bf16.mxu1 %v3398_v1  ;;  %v794_v22 = vmax.f32 %v762_v20, 0.0  ;;  %v712_v44 = vmax.f32 %v4025_v24, %v605_v35  ;;  %v765_v53 = vadd.f32 %v4056_v48, %v711_v8  ;;  %v4132_v59 = vpack.c.bf16 %v793_v11, %v789_v10  ;;  %v3405_v11 = vld [vmem:[%s4506_s4 + $0x68] ss:$12 sps:$4 sm:$0xff]  }
 0x120   :  { %v796_v13 = vmax.f32 %v764_v21, 0.0  ;;  %v714_v45 = vmax.f32 %v4027_v25, %v678_v40  ;;  %v607_v46 = vpop.f32.mrf.mxu0  ;;  %v4130_v58 = vadd.f32 %v4062_v56, %v713_v9  ;;  %v3406_v21 = vld [vmem:[%s4506_s4 + $0x1e8] ss:$12 sps:$4 sm:$0xff]  }
 0x121   :  { %v680_v47 = vpop.f32.mrf.mxu1  ;;  %v4124_v50 = vpack.c.bf16 %v794_v22, %v790_v42  ;;  %v766_v24 = vadd.f32 %v4058_v52, %v712_v44  ;;  %v715_v25 = vmax.f32 %v4029_v26, %v607_v46  ;;  %1576 = vmatpush1.bf16.msra.mxu0 %v3400_v41  ;;  %v3402_v26 = vld [vmem:[%s4506_s4 + $0x80] ss:$12 sps:$4 sm:$0xff]   ;;  %v797_v5 = vmax.f32 %v765_v53, 0.0 }
 0x122   :  { %v4126_v51 = vpack.c.bf16 %v796_v13, %v792_v12  ;;  %3092 = vmatpush3.bf16.msra.mxu1 %v3399_v30  ;;  %v717_v15 = vmax.f32 %v4031_v27, %v680_v47  ;;  %v609_v16 = vpop.f32.mrf.mxu0  ;;  %v768_v62 = vadd.f32 %v4060_v54, %v714_v45  ;;  %v4149_v27 = vpack.c.bf16 %v795_v43, %v791_v23  ;;  %v3407_v13 = vld [vmem:[%s4506_s4 + $0x110] ss:$12 sps:$4 sm:$0xff]  }
 0x123   :  { %v682_v17 = vpop.f32.mrf.mxu1  ;;  %v716_v63 = vmax.f32 %v4033_v28, %v609_v16  ;;  %1404 = vmatprep.mubr.bf16.mxu0 %v4124_v50  ;;  %v769_v2 = vadd.f32 %v4056_v48, %v715_v25  ;;  %3093 = vmatprep.subr.bf16.mxu1 %v3401_v49  ;;  %v798_v8 = vmax.f32 %v766_v24, 0.0  ;;  %v799_v35 = vmax.f32 %v4130_v58, 0.0  ;;  %v3409_v58 = vld [vmem:[%s4506_s4 + $0x1d0] ss:$12 sps:$4 sm:$0xff]  }
 0x124   :  { %v718_v1 = vmax.f32 %v4035_v29, %v682_v17  ;;  %2971 = vmatprep.mubr.msk.bf16.mxu1 %vm1339_vm3, %v4126_v51  ;;  %v771_v3 = vadd.f32 %v4062_v56, %v717_v15  ;;  %1577 = vmatprep.subr.bf16.mxu0 %v3569_v0  ;;  %v613_v28 = vpop.f32.mrf.mxu0  ;;  %v800_v9 = vmax.f32 %v768_v62, 0.0 }
 0x125   :  { %v686_v29 = vpop.f32.mrf.mxu1  ;;  %v770_v18 = vadd.f32 %v4058_v52, %v716_v63  ;;  %1405 = vmatmul.mubr.bf16.gmra.mxu0 %v4132_v59  ;;  %v801_v6 = vmax.f32 %v769_v2, 0.0  ;;  %1478 = vmatmul.mubr.bf16.gmra.mxu1 %v4149_v27  ;;  %v719_v44 = vmax.f32 %v4037_v31, %v613_v28  ;;  %v3412_v63 = vld [vmem:[%s4506_s4 + $0x1b8] ss:$12 sps:$4 sm:$0xff]   ;;  %v3413_v2 = vld [vmem:[%s4506_s4 + $0xe0] ss:$12 sps:$4 sm:$0xff]  }
 0x126   :  { %v772_v19 = vadd.f32 %v4060_v54, %v718_v1  ;;  %1578 = vmatpush1.bf16.msra.mxu0 %v3403_v61  ;;  %v615_v7 = vpop.f32.mrf.mxu0  ;;  %3094 = vmatpush3.bf16.msra.mxu1 %v3402_v26  ;;  %v803_v40 = vmax.f32 %v771_v3, 0.0  ;;  %v721_v45 = vmax.f32 %v4039_v32, %v686_v29 }
 0x127   :  { %v688_v20 = vpop.f32.mrf.mxu1  ;;  %v802_v30 = vmax.f32 %v770_v18, 0.0  ;;  %1579 = vmatprep.subr.bf16.mxu0 %v3569_v0  ;;  %v720_v41 = vmax.f32 %v4041_v33, %v615_v7  ;;  %3095 = vmatprep.subr.bf16.mxu1 %v3404_v4  ;;  %v4180_v46 = vpack.c.bf16 %v801_v6, %v797_v5  ;;  %v3415_v18 = vld [vmem:[%s4506_s4 + $0x1a0] ss:$12 sps:$4 sm:$0xff]   ;;  %v3416_v7 = vld [vmem:[%s4506_s4 + $0xc8] ss:$12 sps:$4 sm:$0xff]  }
 0x128   :  { %v804_v10 = vmax.f32 %v772_v19, 0.0  ;;  %v722_v42 = vmax.f32 %v4043_v34, %v688_v20  ;;  %v617_v12 = vpop.f32.mrf.mxu0  ;;  %v775_v61 = vadd.f32 %v4062_v56, %v721_v45  ;;  %v3414_v5 = vld [vmem:[%s4506_s4 + $0x20] ss:$12 sps:$4 sm:$0xff]   ;;  %v3418_v20 = vld [vmem:[%s4506_s4 + $0x188] ss:$12 sps:$4 sm:$0xff]  }
 0x129   :  { %v690_v22 = vpop.f32.mrf.mxu1  ;;  %v4174_v23 = vpack.c.bf16 %v802_v30, %v798_v8  ;;  %v774_v33 = vadd.f32 %v4058_v52, %v720_v41  ;;  %v723_v34 = vmax.f32 %v4045_v36, %v617_v12  ;;  %v3408_v36 = vld [vmem:[%s4506_s4 + $0x50] ss:$12 sps:$4 sm:$0xff]   ;;  %v3422_v8 = vld [vmem:[%s4506_s4 + $0x260] ss:$0 sps:$4 sm:$0x77]  }
 0x12a   :  { %v4176_v43 = vpack.c.bf16 %v804_v10, %v800_v9  ;;  %v725_v47 = vmax.f32 %v4047_v37, %v690_v22  ;;  %1580 = vmatpush1.bf16.msra.mxu0 %v3406_v21  ;;  %v619_v49 = vpop.f32.mrf.mxu0  ;;  %v776_v24 = vadd.f32 %v4060_v54, %v722_v42  ;;  %3096 = vmatpush3.bf16.msra.mxu1 %v3405_v11  ;;  %v807_v4 = vmax.f32 %v775_v61, 0.0  ;;  %v3417_v21 = vld [vmem:[%s4506_s4 + $0x8] ss:$12 sps:$4 sm:$0xff]   ;;  %v3421_v9 = vld [vmem:[#allocation2 + $0xac] ss:$12 sps:$4 sm:$0xff]  }
 0x12b   :  { %v692_v53 = vpop.f32.mrf.mxu1  ;;  %v724_v31 = vmax.f32 %v4049_v38, %v619_v49  ;;  %1414 = vmatprep.mubr.bf16.mxu0 %v4174_v23  ;;  %v4195_v37 = vpack.c.bf16 %v803_v40, %v799_v35  ;;  %v777_v25 = vadd.f32 %v4056_v48, %v723_v34  ;;  %3097 = vmatprep.subr.bf16.mxu1 %v3407_v13  ;;  %v3410_v38 = vld [vmem:[%s4506_s4 + $0xf8] ss:$12 sps:$4 sm:$0xff]   ;;  %v806_v62 = vmax.f32 %v774_v33, 0.0  ;;  %v3419_v30 = vld [vmem:[#allocation2 + $0xa8] ss:$12 sps:$4 sm:$0xff]  }
 0x12c   :  { %v726_v32 = vmax.f32 %v4051_v39, %v692_v53  ;;  %v779_v15 = vadd.f32 %v4062_v56, %v725_v47  ;;  %2972 = vmatprep.mubr.msk.bf16.mxu1 %vm1339_vm3, %v4176_v43  ;;  %v773_v39 = vadd.f32 %v4056_v48, %v719_v44  ;;  %1581 = vmatprep.subr.bf16.mxu0 %v3569_v0  ;;  %v808_v1 = vmax.f32 %v776_v24, 0.0  ;;  %v3425_v11 = vld [vmem:[#allocation2 + $0x94] ss:$12 sps:$4 sm:$0xff]   ;;  %v3423_v40 = vld [vmem:[#allocation2 + $0x90] ss:$12 sps:$4 sm:$0xff]  }
 0x12d   :  { %v778_v16 = vadd.f32 %v4058_v52, %v724_v31  ;;  %1415 = vmatmul.mubr.bf16.gmra.mxu0 %v4180_v46  ;;  %1488 = vmatmul.mubr.bf16.gmra.mxu1 %v4195_v37  ;;  %v809_v48 = vmax.f32 %v777_v25, 0.0  ;;  %v1360_v10 = vsel %vm1352_vm2, %v3422_v8, 0  ;;  %v3426_v35 = vld [vmem:[%s4506_s4 + $0x248] ss:$12 sps:$4 sm:$0xff]   ;;  %v3432_v41 = vld [vmem:[#allocation2 + $0x22c] ss:$12 sps:$4 sm:$0xff]  }
 0x12e   :  { %v780_v17 = vadd.f32 %v4060_v54, %v726_v32  ;;  %1582 = vmatpush1.bf16.msra.mxu0 %v3409_v58  ;;  %3098 = vmatpush3.bf16.msra.mxu1 %v3408_v36  ;;  %v3411_v54 = vld [vmem:[%s4506_s4 + $0x38] ss:$12 sps:$4 sm:$0xff]   ;;  %v811_v56 = vmax.f32 %v779_v15, 0.0  ;;  %v805_v3 = vmax.f32 %v773_v39, 0.0  ;;  %v3429_v42 = vld [vmem:[#allocation2 + $0x7c] ss:$12 sps:$4 sm:$0xff]  }
 0x12f   :  { %v810_v26 = vmax.f32 %v778_v16, 0.0  ;;  %1583 = vmatprep.subr.bf16.mxu0 %v3569_v0  ;;  %3099 = vmatprep.subr.bf16.mxu1 %v3410_v38  ;;  %v3427_v12 = vld [vmem:[#allocation2 + $0x78] ss:$12 sps:$4 sm:$0xff]   ;;  %v3430_v22 = vld [vmem:[#allocation2 + $0x228] ss:$12 sps:$4 sm:$0xff]  }
 0x130   :  { %v812_v52 = vmax.f32 %v780_v17, 0.0  ;;  %v4228_v19 = vpack.c.bf16 %v809_v48, %v805_v3  ;;  %v4234_v6 = vpack.c.bf16 %v811_v56, %v807_v4  ;;  %v3435_v13 = vld [vmem:[#allocation2 + $0x64] ss:$12 sps:$4 sm:$0xff]   ;;  %v3438_v44 = vld [vmem:[#allocation2 + $0x214] ss:$12 sps:$4 sm:$0xff]  }
 0x131   :  { %v4221_v28 = vpack.c.bf16 %v810_v26, %v806_v62  ;;  %v3433_v45 = vld [vmem:[#allocation2 + $0x60] ss:$12 sps:$4 sm:$0xff]   ;;  %v3436_v33 = vld [vmem:[#allocation2 + $0x210] ss:$12 sps:$4 sm:$0xff]   ;;  %v3439_v49 = vld [vmem:[#allocation2 + $0x48] ss:$12 sps:$4 sm:$0xff]  }
 0x132   :  { %v4223_v29 = vpack.c.bf16 %v812_v52, %v808_v1  ;;  %1584 = vmatpush1.bf16.msra.mxu0 %v3412_v63  ;;  %3100 = vmatpush3.bf16.msra.mxu1 %v3411_v54  ;;  %v3441_v34 = vld [vmem:[#allocation2 + $0x4c] ss:$12 sps:$4 sm:$0xff]   ;;  %v3444_v47 = vld [vmem:[#allocation2 + $0x1fc] ss:$12 sps:$4 sm:$0xff]   ;;  %v3447_v58 = vld [vmem:[#allocation2 + $0x34] ss:$12 sps:$4 sm:$0xff]  }
 0x133   :  { %1424 = vmatprep.mubr.bf16.mxu0 %v4221_v28  ;;  %3101 = vmatprep.subr.bf16.mxu1 %v3413_v2  ;;  %v3442_v53 = vld [vmem:[#allocation2 + $0x1f8] ss:$12 sps:$4 sm:$0xff]   ;;  %v3445_v31 = vld [vmem:[#allocation2 + $0x30] ss:$12 sps:$4 sm:$0xff]   ;;  %v3448_v32 = vld [vmem:[#allocation2 + $0x1e0] ss:$12 sps:$4 sm:$0xff]  }
 0x134   :  { %2973 = vmatprep.mubr.msk.bf16.mxu1 %vm1339_vm3, %v4223_v29  ;;  %1585 = vmatprep.subr.bf16.mxu0 %v3569_v0  ;;  %v3450_v24 = vld [vmem:[#allocation2 + $0x1e4] ss:$12 sps:$4 sm:$0xff]   ;;  %v3453_v36 = vld [vmem:[#allocation2 + $0x1c] ss:$12 sps:$4 sm:$0xff]   ;;  %v3456_v25 = vld [vmem:[#allocation2 + $0x1cc] ss:$12 sps:$4 sm:$0xff]  }
 0x135   :  { %1425 = vmatmul.mubr.bf16.gmra.mxu0 %v4228_v19  ;;  %1498 = vmatmul.mubr.bf16.gmra.mxu1 %v4234_v6  ;;  %v3451_v15 = vld [vmem:[#allocation2 + $0x18] ss:$12 sps:$4 sm:$0xff]   ;;  %v3454_v38 = vld [vmem:[#allocation2 + $0x1c8] ss:$12 sps:$4 sm:$0xff]   ;;  %v3457_v17 = vld [vmem:[#allocation2] ss:$12 sps:$4 sm:$0xff]  }
 0x136   :  { %1586 = vmatpush1.bf16.msra.mxu0 %v3415_v18  ;;  %3102 = vmatpush3.bf16.msra.mxu1 %v3414_v5  ;;  %v3459_v39 = vld [vmem:[#allocation2 + $0x4] ss:$12 sps:$4 sm:$0xff]   ;;  %v3462_v16 = vld [vmem:[#allocation2 + $0x1b4] ss:$12 sps:$4 sm:$0xff]   ;;  %v3465_v62 = vld [vmem:[#allocation2 + $0x16c] ss:$12 sps:$4 sm:$0xff]  }
 0x137   :  { %1540 = vmatprep.mubr.bf16.mxu1 %v4078_v55  ;;  %2974 = vmatprep.mubr.msk.bf16.mxu0 %vm1339_vm3, %v4080_v57  ;;  %v3460_v61 = vld [vmem:[#allocation2 + $0x1b0] ss:$12 sps:$4 sm:$0xff]   ;;  %v3463_v1 = vld [vmem:[#allocation2 + $0x168] ss:$12 sps:$4 sm:$0xff]   ;;  %v3466_v48 = vld [vmem:[#allocation2 + $0x198] ss:$12 sps:$4 sm:$0xff]  }
 0x138   :  { %3103 = vmatprep.subr.bf16.mxu1 %v3416_v7  ;;  %1587 = vmatprep.subr.bf16.mxu0 %v3569_v0  ;;  %v3468_v63 = vld [vmem:[#allocation2 + $0x19c] ss:$12 sps:$4 sm:$0xff]   ;;  %v3471_v26 = vld [vmem:[#allocation2 + $0x154] ss:$12 sps:$4 sm:$0xff]   ;;  %v3474_v52 = vld [vmem:[#allocation2 + $0x184] ss:$12 sps:$4 sm:$0xff]  }
 0x139   :  { %v1738_v54 = vld [vmem:[#allocation2 + $0x258] sm:$0x77]  ;;  %v3472_v2 = vld [vmem:[#allocation2 + $0x180] ss:$12 sps:$4 sm:$0xff]  }
 0x13a   :  { %1588 = vmatpush1.bf16.msra.mxu0 %v3418_v20  ;;  %3104 = vmatpush3.bf16.msra.mxu1 %v3417_v21  ;;  %v3469_v56 = vld [vmem:[#allocation2 + $0x150] ss:$12 sps:$4 sm:$0xff]   ;;  %v3054_v4 = vcombine.high %v1738_v54, %v1738_v54  ;;  %v3053_v18 = vcombine.low %v1738_v54, %v1738_v54  ;;  %v3475_v5 = vld [vmem:[#allocation2 + $0x138] ss:$12 sps:$4 sm:$0xff]   ;;  %v3480_v8 = vld [vmem:[#allocation2 + $0x120] ss:$12 sps:$4 sm:$0xff]  }
 0x13b   :  { %1601 = vmatprep.subr.bf16.mxu0 %v3569_v0  ;;  %2157 = vmatprep.subr.bf16.mxu1 %v3421_v9  ;;  %v3477_v3 = vld [vmem:[#allocation2 + $0x13c] ss:$12 sps:$4 sm:$0xff]   ;;  %v3482_v20 = vld [vmem:[#allocation2 + $0x124] ss:$12 sps:$4 sm:$0xff]   ;;  %v3483_v9 = vld [vmem:[#allocation2 + $0x240] ss:$12 sps:$4 sm:$0xff]  }
 0x13c   :  { %v2149_v7 = vsel %vm1352_vm2, %v3053_v18, 0  ;;  %v3485_v21 = vld [vmem:[#allocation2 + $0x244] ss:$12 sps:$4 sm:$0xff]  }
 0x13d   :  { %1541 = vmatmul.mubr.bf16.vlgmr.msra.gmra.mxu1 %v4076_v14 }
 0x13e   :  { %1602 = vmatpush2.bf16.msra.mxu0 %v1360_v10  ;;  %2158 = vmatpush1.bf16.msra.mxu1 %v3419_v30  ;;  %v3488_v30 = vld [vmem:[#allocation2 + $0x10c] ss:$12 sps:$4 sm:$0xff]   ;;  %v3486_v10 = vld [vmem:[#allocation2 + $0x108] ss:$12 sps:$4 sm:$0xff]  }
 0x13f   :  { %1548 = vmatprep.mubr.bf16.mxu1 %v4124_v50  ;;  %1603 = vmatprep.subr.bf16.mxu0 %v3569_v0 }
 0x140   :  { %2159 = vmatprep.subr.bf16.mxu1 %v3425_v11  ;;  %v3489_v11 = vld [vmem:[#allocation2 + $0x230] ss:$12 sps:$4 sm:$0xff]  }
 0x142   :  { %1604 = vmatpush2.bf16.msra.mxu0 %v3426_v35  ;;  %2160 = vmatpush1.bf16.msra.mxu1 %v3423_v40  ;;  %v3492_v35 = vld [vmem:[#allocation2 + $0xf4] ss:$12 sps:$4 sm:$0xff]   ;;  %v3490_v40 = vld [vmem:[#allocation2 + $0xf0] ss:$12 sps:$4 sm:$0xff]  }
 0x143   :  { %2230 = vmatprep.subr.bf16.mxu0 %v3432_v41  ;;  %2161 = vmatprep.subr.bf16.mxu1 %v3429_v42  ;;  %v3493_v41 = vld [vmem:[#allocation2 + $0x218] ss:$12 sps:$4 sm:$0xff]   ;;  %v3496_v42 = vld [vmem:[#allocation2 + $0xdc] ss:$12 sps:$4 sm:$0xff]  }
 0x145   :  { %1606 = vmatmul.mubr.bf16.vlgmr.msra.gmra.mxu0 %v4086_v60  ;;  %1549 = vmatmul.mubr.bf16.gmra.mxu1 %v4132_v59 }
 0x146   :  { %2975 = vmatprep.mubr.msk.bf16.mxu0 %vm1339_vm3, %v4126_v51  ;;  %2162 = vmatpush1.bf16.msra.mxu1 %v3427_v12  ;;  %v3494_v12 = vld [vmem:[#allocation2 + $0xd8] ss:$12 sps:$4 sm:$0xff]  }
 0x147   :  { %2231 = vmatpush1.bf16.msra.mxu0 %v3430_v22  ;;  %1556 = vmatprep.mubr.bf16.mxu1 %v4174_v23  ;;  %v3497_v22 = vld [vmem:[#allocation2 + $0x200] ss:$12 sps:$4 sm:$0xff]  }
 0x148   :  { %2163 = vmatprep.subr.bf16.mxu1 %v3435_v13  ;;  %2232 = vmatprep.subr.bf16.mxu0 %v3438_v44  ;;  %v3500_v13 = vld [vmem:[#allocation2 + $0xc4] ss:$12 sps:$4 sm:$0xff]   ;;  %v3498_v44 = vld [vmem:[#allocation2 + $0xc0] ss:$12 sps:$4 sm:$0xff]  }
 0x14a   :  { %2164 = vmatpush1.bf16.msra.mxu1 %v3433_v45  ;;  %v3501_v45 = vld [vmem:[#allocation2 + $0x1e8] ss:$12 sps:$4 sm:$0xff]  }
 0x14b   :  { %2233 = vmatpush1.bf16.msra.mxu0 %v3436_v33  ;;  %2165 = vmatprep.subr.bf16.mxu1 %v3441_v34  ;;  %v3502_v33 = vld [vmem:[#allocation2 + $0x170] ss:$12 sps:$4 sm:$0xff]  }
 0x14c   :  { %2234 = vmatprep.subr.bf16.mxu0 %v3444_v47  ;;  %v3503_v34 = vld [vmem:[#allocation2 + $0xb0] ss:$12 sps:$4 sm:$0xff]  }
 0x14d   :  { %1614 = vmatmul.mubr.bf16.gmra.mxu0 %v4149_v27  ;;  %1557 = vmatmul.mubr.bf16.gmra.mxu1 %v4180_v46  ;;  %v3504_v47 = vld [vmem:[#allocation2 + $0x1d0] ss:$12 sps:$4 sm:$0xff]  }
 0x14e   :  { %2976 = vmatprep.mubr.msk.bf16.mxu0 %vm1339_vm3, %v4176_v43  ;;  %2166 = vmatpush1.bf16.msra.mxu1 %v3439_v49  ;;  %v3505_v49 = vld [vmem:[#allocation2 + $0x158] ss:$12 sps:$4 sm:$0xff]  }
 0x14f   :  { %2235 = vmatpush1.bf16.msra.mxu0 %v3442_v53  ;;  %1564 = vmatprep.mubr.bf16.mxu1 %v4221_v28  ;;  %v3506_v53 = vld [vmem:[#allocation2 + $0x98] ss:$12 sps:$4 sm:$0xff]  }
 0x150   :  { %2167 = vmatprep.subr.bf16.mxu1 %v3447_v58  ;;  %2236 = vmatprep.subr.bf16.mxu0 %v3450_v24  ;;  %v3507_v58 = vld [vmem:[#allocation2 + $0x1b8] ss:$12 sps:$4 sm:$0xff]   ;;  %v3508_v24 = vld [vmem:[#allocation2 + $0x140] ss:$12 sps:$4 sm:$0xff]  }
 0x152   :  { %2168 = vmatpush1.bf16.msra.mxu1 %v3445_v31  ;;  %v3509_v31 = vld [vmem:[#allocation2 + $0x80] ss:$12 sps:$4 sm:$0xff]  }
 0x153   :  { %2237 = vmatpush1.bf16.msra.mxu0 %v3448_v32  ;;  %2169 = vmatprep.subr.bf16.mxu1 %v3453_v36  ;;  %v3510_v32 = vld [vmem:[#allocation2 + $0x1a0] ss:$12 sps:$4 sm:$0xff]   ;;  %v3511_v36 = vld [vmem:[#allocation2 + $0x128] ss:$12 sps:$4 sm:$0xff]  }
 0x154   :  { %2238 = vmatprep.subr.bf16.mxu0 %v3456_v25  ;;  %v3512_v25 = vld [vmem:[#allocation2 + $0x68] ss:$12 sps:$4 sm:$0xff]  }
 0x155   :  { %1622 = vmatmul.mubr.bf16.gmra.mxu0 %v4195_v37  ;;  %1565 = vmatmul.mubr.bf16.gmra.mxu1 %v4228_v19 }
 0x156   :  { %2977 = vmatprep.mubr.msk.bf16.mxu0 %vm1339_vm3, %v4223_v29  ;;  %2170 = vmatpush1.bf16.msra.mxu1 %v3451_v15  ;;  %v3513_v15 = vld [vmem:[#allocation2 + $0x188] ss:$12 sps:$4 sm:$0xff]  }
 0x157   :  { %2239 = vmatpush1.bf16.msra.mxu0 %v3454_v38  ;;  %2189 = vmatprep.mubr.bf16.mxu1 %v4078_v55  ;;  %v3514_v38 = vld [vmem:[#allocation2 + $0x110] ss:$12 sps:$4 sm:$0xff]  }
 0x158   :  { %2171 = vmatprep.subr.bf16.mxu1 %v3459_v39  ;;  %2240 = vmatprep.subr.bf16.mxu0 %v3462_v16  ;;  %v3516_v39 = vld [vmem:[#allocation2 + $0x260] ss:$0 sps:$4 sm:$0x77]   ;;  %v3515_v16 = vld [vmem:[#allocation2 + $0x50] ss:$12 sps:$4 sm:$0xff]  }
 0x15a   :  { %2172 = vmatpush1.bf16.msra.mxu1 %v3457_v17  ;;  %v2155_v17 = vsel %vm1352_vm2, %v3516_v39, 0 }
 0x15b   :  { %2241 = vmatpush1.bf16.msra.mxu0 %v3460_v61  ;;  %2173 = vmatprep.subr.bf16.mxu1 %v3465_v62  ;;  %v3517_v61 = vld [vmem:[#allocation2 + $0xf8] ss:$12 sps:$4 sm:$0xff]   ;;  %v3519_v62 = vld [vmem:[#allocation2 + $0x248] ss:$12 sps:$4 sm:$0xff]  }
 0x15c   :  { %2242 = vmatprep.subr.bf16.mxu0 %v3468_v63  ;;  %v3520_v63 = vld [vmem:[#allocation2 + $0xe0] ss:$12 sps:$4 sm:$0xff]  }
 0x15d   :  { %1630 = vmatmul.mubr.bf16.gmra.mxu0 %v4234_v6 }
 0x15e   :  { %3057 = vmatprep.mubr.msk.bf16.mxu0 %vm1339_vm3, %v4080_v57  ;;  %2174 = vmatpush2.bf16.msra.mxu1 %v3463_v1  ;;  %v3521_v1 = vld [vmem:[#allocation2 + $0x20] ss:$12 sps:$4 sm:$0xff]  }
 0x15f   :  { %2243 = vmatpush1.bf16.msra.mxu0 %v3466_v48  ;;  %2175 = vmatprep.subr.bf16.mxu1 %v3471_v26  ;;  %v3522_v48 = vld [vmem:[#allocation2 + $0xc8] ss:$12 sps:$4 sm:$0xff]  }
 0x160   :  { %2244 = vmatprep.subr.bf16.mxu0 %v3474_v52  ;;  %v3523_v26 = vld [vmem:[#allocation2 + $0x8] ss:$12 sps:$4 sm:$0xff]  }
 0x162   :  { %2176 = vmatpush2.bf16.msra.mxu1 %v3469_v56 }
 0x163   :  { %2245 = vmatpush1.bf16.msra.mxu0 %v3472_v2  ;;  %2177 = vmatprep.subr.bf16.mxu1 %v3477_v3 }
 0x164   :  { %3056 = vmatprep.subr.msk.bf16.mxu0 %vm1352_vm2, %v3054_v4 }
 0x166   :  { %2178 = vmatpush2.bf16.msra.mxu1 %v3475_v5 }
 0x167   :  { %2259 = vmatpush2.bf16.msra.mxu0 %v2149_v7  ;;  %2179 = vmatprep.subr.bf16.mxu1 %v3482_v20  ;;  %v3540_v20 = vld [vmem:[%s4508_s6 + $0x98] sm:$0x1f]  }
 0x168   :  { %2260 = vmatprep.subr.bf16.mxu0 %v3485_v21 }
 0x16a   :  { %2180 = vmatpush2.bf16.msra.mxu1 %v3480_v8 }
 0x16b   :  { %2261 = vmatpush2.bf16.msra.mxu0 %v3483_v9  ;;  %2181 = vmatprep.subr.bf16.mxu1 %v3488_v30  ;;  %v3570_v9 = vmov 65535  }
 0x16c   :  { %2368 = vmatprep.subr.bf16.mxu0 %v3569_v0  ;;  %v2666_v30 = vsel %vm222_vm0, 4294967295, %v3570_v9 }
 0x16e   :  { %2263 = vmatmul.mubr.bf16.vlgmr.msra.gmra.mxu0 %v4086_v60  ;;  %2182 = vmatpush2.bf16.msra.mxu1 %v3486_v10 }
 0x16f   :  { %3058 = vmatprep.mubr.msk.bf16.mxu0 %vm1339_vm3, %v4126_v51  ;;  %2369 = vmatpush1.bf16.msra.mxu0 %v3489_v11  ;;  %v2667_v11 = vsel %vm2665_vm4, %v2666_v30, 0 }
 0x170   :  { %2183 = vmatprep.subr.bf16.mxu1 %v3492_v35  ;;  %2370 = vmatprep.subr.bf16.mxu0 %v3569_v0  ;;  %v2669_v35 = vand.u32 %v3540_v20, %v2667_v11 }
 0x172   :  { %2184 = vmatpush2.bf16.msra.mxu1 %v3490_v40 }
 0x173   :  { %2371 = vmatpush1.bf16.msra.mxu0 %v3493_v41  ;;  %2185 = vmatprep.subr.bf16.mxu1 %v3496_v42 }
 0x174   :  { %2372 = vmatprep.subr.bf16.mxu0 %v3569_v0 }
 0x176   :  { %2273 = vmatmul.mubr.bf16.gmra.mxu0 %v4149_v27  ;;  %2186 = vmatpush2.bf16.msra.mxu1 %v3494_v12 }
 0x177   :  { %3059 = vmatprep.mubr.msk.bf16.mxu0 %vm1339_vm3, %v4176_v43  ;;  %2373 = vmatpush1.bf16.msra.mxu0 %v3497_v22 }
 0x178   :  { %2187 = vmatprep.subr.bf16.mxu1 %v3500_v13  ;;  %2374 = vmatprep.subr.bf16.mxu0 %v3569_v0 }
 0x17a   :  { %2188 = vmatpush2.bf16.msra.mxu1 %v3498_v44 }
 0x17b   :  { %2375 = vmatpush1.bf16.msra.mxu0 %v3501_v45  ;;  %3129 = vmatprep.subr.bf16.mxu1 %v3502_v33  ;;  %v3541_v33 = vld [vmem:[%s4508_s6 + $0x90] sm:$0xff]  }
 0x17c   :  { %2376 = vmatprep.subr.bf16.mxu0 %v3569_v0 }
 0x17d   :  { %2190 = vmatmul.mubr.bf16.vlgmr.msra.gmra.mxu1 %v4076_v14 }
 0x17e   :  { %2283 = vmatmul.mubr.bf16.gmra.mxu0 %v4195_v37  ;;  %2199 = vmatprep.mubr.bf16.mxu1 %v4124_v50 }
 0x17f   :  { %3060 = vmatprep.mubr.msk.bf16.mxu0 %vm1339_vm3, %v4223_v29  ;;  %3130 = vmatpush3.bf16.msra.mxu1 %v3503_v34 }
 0x180   :  { %2377 = vmatpush1.bf16.msra.mxu0 %v3504_v47  ;;  %3131 = vmatprep.subr.bf16.mxu1 %v3505_v49 }
 0x181   :  { %2378 = vmatprep.subr.bf16.mxu0 %v3569_v0 }
 0x183   :  { %3132 = vmatpush3.bf16.msra.mxu1 %v3506_v53 }
 0x184   :  { %2379 = vmatpush1.bf16.msra.mxu0 %v3507_v58  ;;  %3133 = vmatprep.subr.bf16.mxu1 %v3508_v24 }
 0x185   :  { %2380 = vmatprep.subr.bf16.mxu0 %v3569_v0  ;;  %2200 = vmatmul.mubr.bf16.gmra.mxu1 %v4132_v59 }
 0x186   :  { %2293 = vmatmul.mubr.bf16.gmra.mxu0 %v4234_v6  ;;  %2209 = vmatprep.mubr.bf16.mxu1 %v4174_v23 }
 0x187   :  { %3061 = vmatprep.mubr.msk.bf16.mxu0 %vm1339_vm3, %v4080_v57  ;;  %3134 = vmatpush3.bf16.msra.mxu1 %v3509_v31  ;;  %v3518_v57 = vld [vmem:[#allocation2 + $0x38] ss:$12 sps:$4 sm:$0xff]   ;;  %v3542_v31 = vld [vmem:[%s4508_s6 + $0x88] sm:$0xff]  }
 0x188   :  { %2381 = vmatpush1.bf16.msra.mxu0 %v3510_v32  ;;  %3135 = vmatprep.subr.bf16.mxu1 %v3511_v36 }
 0x189   :  { %2382 = vmatprep.subr.bf16.mxu0 %v3569_v0 }
 0x18b   :  { %3136 = vmatpush3.bf16.msra.mxu1 %v3512_v25 }
 0x18c   :  { %2383 = vmatpush1.bf16.msra.mxu0 %v3513_v15  ;;  %3137 = vmatprep.subr.bf16.mxu1 %v3514_v38 }
 0x18d   :  { %2396 = vmatprep.subr.bf16.mxu0 %v3569_v0  ;;  %2210 = vmatmul.mubr.bf16.gmra.mxu1 %v4180_v46 }
 0x18e   :  { %2219 = vmatprep.mubr.bf16.mxu1 %v4221_v28 }
 0x18f   :  { %3138 = vmatpush3.bf16.msra.mxu1 %v3515_v16  ;;  %v3543_v16 = vld [vmem:[%s4508_s6 + $0x80] sm:$0xff]  }
 0x190   :  { %2397 = vmatpush2.bf16.msra.mxu0 %v2155_v17  ;;  %3139 = vmatprep.subr.bf16.mxu1 %v3517_v61 }
 0x191   :  { %2398 = vmatprep.subr.bf16.mxu0 %v3569_v0  ;;  %v3524_v0 = vld [vmem:[%s4508_s6 + $0x78] sm:$0xff]  }
 0x193   :  { %3140 = vmatpush3.bf16.msra.mxu1 %v3518_v57 }
 0x194   :  { %2399 = vmatpush2.bf16.msra.mxu0 %v3519_v62  ;;  %3141 = vmatprep.subr.bf16.mxu1 %v3520_v63 }
 0x195   :  { %2220 = vmatmul.mubr.bf16.gmra.mxu1 %v4228_v19  ;;  %3217 = vmatprep.subr.bf16.mxu0 %v2669_v35 }
 0x196   :  { %2335 = vmatprep.mubr.bf16.mxu1 %v4078_v55  ;;  %v3526_v55 = vld [vmem:[%s4508_s6 + $0x70] sm:$0xff]  }
 0x197   :  { %2401 = vmatmul.mubr.bf16.vlgmr.msra.gmra.mxu0 %v4086_v60  ;;  %3142 = vmatpush3.bf16.msra.mxu1 %v3521_v1  ;;  %v3527_v60 = vld [vmem:[%s4508_s6 + $0x30] sm:$0xff]  }
 0x198   :  { %3062 = vmatprep.mubr.msk.bf16.mxu0 %vm1339_vm3, %v4126_v51  ;;  %3143 = vmatprep.subr.bf16.mxu1 %v3522_v48  ;;  %v3529_v51 = vld [vmem:[%s4508_s6 + $0x28] sm:$0xff]  }
 0x199   :  { %3218 = vmatpush3.bf16.msra.mxu0 %v2669_v35 }
 0x19a   :  { %3219 = vmatprep.subr.bf16.mxu0 %v3541_v33 }
 0x19b   :  { %3144 = vmatpush3.bf16.msra.mxu1 %v3523_v26 }
 0x19c   :  { %3169 = vmatprep.subr.bf16.mxu1 %v3524_v0 }
 0x19d   :  { %3220 = vmatpush3.bf16.msra.mxu0 %v3541_v33 }
 0x19e   :  { %2336 = vmatmul.mubr.bf16.vlgmr.msra.gmra.mxu1 %v4076_v14  ;;  %v3525_v14 = vld [vmem:[%s4508_s6 + $0x38] sm:$0xff]   ;;  %3221 = vmatprep.subr.bf16.mxu0 %v3542_v31 }
 0x19f   :  { %2409 = vmatmul.mubr.bf16.gmra.mxu0 %v4149_v27  ;;  %2343 = vmatprep.mubr.bf16.mxu1 %v4124_v50  ;;  %v3528_v50 = vld [vmem:[%s4508_s6 + $0x68] sm:$0xff]   ;;  %v3531_v27 = vld [vmem:[%s4508_s6 + $0x20] sm:$0xff]  }
 0x1a0   :  { %3063 = vmatprep.mubr.msk.bf16.mxu0 %vm1339_vm3, %v4176_v43  ;;  %3170 = vmatpush3.bf16.msra.mxu1 %v3525_v14  ;;  %v3533_v43 = vld [vmem:[%s4508_s6 + $0x18] sm:$0xff]  }
 0x1a1   :  { %3171 = vmatprep.subr.bf16.mxu1 %v3526_v55  ;;  %3222 = vmatpush3.bf16.msra.mxu0 %v3542_v31 }
 0x1a2   :  { %3223 = vmatprep.subr.bf16.mxu0 %v3543_v16 }
 0x1a4   :  { %3172 = vmatpush3.bf16.msra.mxu1 %v3527_v60 }
 0x1a5   :  { %3173 = vmatprep.subr.bf16.mxu1 %v3528_v50  ;;  %3224 = vmatpush3.bf16.msra.mxu0 %v3543_v16 }
 0x1a6   :  { %2344 = vmatmul.mubr.bf16.gmra.mxu1 %v4132_v59  ;;  %v3530_v59 = vld [vmem:[%s4508_s6 + $0x60] sm:$0xff]  }
 0x1a7   :  { %2417 = vmatmul.mubr.bf16.gmra.mxu0 %v4195_v37  ;;  %2351 = vmatprep.mubr.bf16.mxu1 %v4174_v23  ;;  %v3532_v23 = vld [vmem:[%s4508_s6 + $0x58] sm:$0xff]   ;;  %v3535_v37 = vld [vmem:[%s4508_s6 + $0x10] sm:$0xff]  }
 0x1a8   :  { %3064 = vmatprep.mubr.msk.bf16.mxu0 %vm1339_vm3, %v4223_v29  ;;  %3174 = vmatpush3.bf16.msra.mxu1 %v3529_v51  ;;  %v3537_v29 = vld [vmem:[%s4508_s6 + $0x8] sm:$0xff]  }
 0x1a9   :  { %3175 = vmatprep.subr.bf16.mxu1 %v3530_v59 }
 0x1ac   :  { %3176 = vmatpush3.bf16.msra.mxu1 %v3531_v27 }
 0x1ad   :  { %3177 = vmatprep.subr.bf16.mxu1 %v3532_v23 }
 0x1ae   :  { %2352 = vmatmul.mubr.bf16.gmra.mxu1 %v4180_v46  ;;  %v3534_v46 = vld [vmem:[%s4508_s6 + $0x50] sm:$0xff]  }
 0x1af   :  { %2425 = vmatmul.mubr.bf16.gmra.mxu0 %v4234_v6  ;;  %2359 = vmatprep.mubr.bf16.mxu1 %v4221_v28  ;;  %v3536_v28 = vld [vmem:[%s4508_s6 + $0x48] sm:$0xff]   ;;  %v3539_v6 = vld [vmem:[%s4508_s6] sm:$0xff]  }
 0x1b0   :  { %3178 = vmatpush3.bf16.msra.mxu1 %v3533_v43 }
 0x1b1   :  { %3179 = vmatprep.subr.bf16.mxu1 %v3534_v46 }
 0x1b4   :  { %3180 = vmatpush3.bf16.msra.mxu1 %v3535_v37 }
 0x1b5   :  { %3181 = vmatprep.subr.bf16.mxu1 %v3536_v28 }
 0x1b6   :  { %2360 = vmatmul.mubr.bf16.gmra.mxu1 %v4228_v19  ;;  %v3538_v19 = vld [vmem:[%s4508_s6 + $0x40] sm:$0xff]  }
 0x1b8   :  { %3182 = vmatpush3.bf16.msra.mxu1 %v3537_v29 }
 0x1b9   :  { %3183 = vmatprep.subr.bf16.mxu1 %v3538_v19 }
 0x1bc   :  { %3184 = vmatpush3.bf16.msra.mxu1 %v3539_v6 }
 0x1dc   :  { %v1396_v52 = vpop.f32.mrf.mxu0 }
 0x1dd   :  { %v1469_v54 = vpop.f32.mrf.mxu1 }
 0x1de   :  { %v4381_v56 = vadd.f32 %v1469_v54, %v1396_v52  ;;  %v1398_v2 = vpop.f32.mrf.mxu0 }
 0x1df   :  { %v1471_v3 = vpop.f32.mrf.mxu1 }
 0x1e0   :  { %v4383_v4 = vadd.f32 %v1471_v3, %v1398_v2  ;;  %v1400_v18 = vpop.f32.mrf.mxu0 }
 0x1e1   :  { %v1473_v5 = vpop.f32.mrf.mxu1 }
 0x1e2   :  { %v4385_v7 = vadd.f32 %v1473_v5, %v1400_v18  ;;  %v1402_v21 = vpop.f32.mrf.mxu0 }
 0x1e3   :  { %v1475_v8 = vpop.f32.mrf.mxu1 }
 0x1e4   :  { %v4391_v10 = vadd.f32 %v1475_v8, %v1402_v21 }
 0x1e5   :  { %v1406_v40 = vpop.f32.mrf.mxu0  ;;  %v1479_v41 = vpop.f32.mrf.mxu1 }
 0x1e6   :  { %v4393_v42 = vadd.f32 %v1479_v41, %v1406_v40 }
 0x1e7   :  { %v1408_v12 = vpop.f32.mrf.mxu0  ;;  %v1481_v22 = vpop.f32.mrf.mxu1 }
 0x1e8   :  { %v4395_v13 = vadd.f32 %v1481_v22, %v1408_v12 }
 0x1e9   :  { %v1410_v44 = vpop.f32.mrf.mxu0  ;;  %v1483_v45 = vpop.f32.mrf.mxu1 }
 0x1ea   :  { %v4400_v34 = vadd.f32 %v1483_v45, %v1410_v44 }
 0x1eb   :  { %v1412_v47 = vpop.f32.mrf.mxu0  ;;  %v1485_v49 = vpop.f32.mrf.mxu1 }
 0x1ec   :  { %v4402_v53 = vadd.f32 %v1485_v49, %v1412_v47 }
 0x1ed   :  { %v1416_v58 = vpop.f32.mrf.mxu0  ;;  %v1489_v24 = vpop.f32.mrf.mxu1 }
 0x1ee   :  { %v4407_v32 = vadd.f32 %v1489_v24, %v1416_v58 }
 0x1ef   :  { %v1418_v36 = vpop.f32.mrf.mxu0  ;;  %v1491_v25 = vpop.f32.mrf.mxu1 }
 0x1f0   :  { %v4409_v15 = vadd.f32 %v1491_v25, %v1418_v36 }
 0x1f1   :  { %v1420_v38 = vpop.f32.mrf.mxu0  ;;  %v1493_v39 = vpop.f32.mrf.mxu1 }
 0x1f2   :  { %v4414_v17 = vadd.f32 %v1493_v39, %v1420_v38 }
 0x1f3   :  { %v1422_v61 = vpop.f32.mrf.mxu0  ;;  %v1495_v57 = vpop.f32.mrf.mxu1 }
 0x1f4   :  { %v4416_v62 = vadd.f32 %v1495_v57, %v1422_v61 }
 0x1f5   :  { %v1426_v63 = vpop.f32.mrf.mxu0  ;;  %v1499_v1 = vpop.f32.mrf.mxu1 }
 0x1f6   :  { %v4418_v48 = vadd.f32 %v1499_v1, %v1426_v63 }
 0x1f7   :  { %v1428_v26 = vpop.f32.mrf.mxu0  ;;  %v1501_v0 = vpop.f32.mrf.mxu1 }
 0x1f8   :  { %v4420_v14 = vadd.f32 %v1501_v0, %v1428_v26 }
 0x1f9   :  { %v1430_v55 = vpop.f32.mrf.mxu0  ;;  %v1503_v60 = vpop.f32.mrf.mxu1 }
 0x1fa   :  { %v4422_v50 = vadd.f32 %v1503_v60, %v1430_v55 }
 0x1fb   :  { %v1432_v51 = vpop.f32.mrf.mxu0  ;;  %v1505_v59 = vpop.f32.mrf.mxu1 }
 0x1fc   :  { %v4424_v27 = vadd.f32 %v1505_v59, %v1432_v51 }
 0x1fd   :  { %v3105_v23 = vpop.f32.mrf.mxu1 }
 0x1ff   :  { %v3106_v43 = vpop.f32.mrf.mxu1 }
 0x200   :  { %v3107_v46 = vadd.f32 %v3106_v43, %v3105_v23 }
 0x201   :  { %v3108_v37 = vpop.f32.mrf.mxu1 }
 0x203   :  { %v3109_v28 = vpop.f32.mrf.mxu1 }
 0x204   :  { %v3110_v29 = vadd.f32 %v3109_v28, %v3108_v37 }
 0x205   :  { %v1607_v19 = vpop.f32.mrf.mxu0  ;;  %v3111_v52 = vpop.f32.mrf.mxu1 }
 0x206   :  { %v4426_v6 = vadd.f32 %v3107_v46, %v1607_v19 }
 0x207   :  { %v1609_v54 = vpop.f32.mrf.mxu0  ;;  %v3112_v2 = vpop.f32.mrf.mxu1 }
 0x208   :  { %v3113_v3 = vadd.f32 %v3112_v2, %v3111_v52 }
 0x209   :  { %v1610_v18 = vpop.f32.mrf.mxu0  ;;  %v3114_v20 = vpop.f32.mrf.mxu1 }
 0x20a   :  { %v4428_v5 = vadd.f32 %v3110_v29, %v1610_v18 }
 0x20b   :  { %v1612_v21 = vpop.f32.mrf.mxu0  ;;  %v3115_v8 = vpop.f32.mrf.mxu1 }
 0x20c   :  { %v3116_v9 = vadd.f32 %v3115_v8, %v3114_v20 }
 0x20d   :  { %v1615_v30 = vpop.f32.mrf.mxu0  ;;  %v3117_v35 = vpop.f32.mrf.mxu1 }
 0x20e   :  { %v4430_v11 = vadd.f32 %v3113_v3, %v1615_v30 }
 0x20f   :  { %v1617_v40 = vpop.f32.mrf.mxu0  ;;  %v3118_v41 = vpop.f32.mrf.mxu1 }
 0x210   :  { %v3119_v12 = vadd.f32 %v3118_v41, %v3117_v35 }
 0x211   :  { %v1618_v22 = vpop.f32.mrf.mxu0  ;;  %v3120_v45 = vpop.f32.mrf.mxu1 }
 0x212   :  { %v4432_v44 = vadd.f32 %v3116_v9, %v1618_v22 }
 0x213   :  { %v1620_v33 = vpop.f32.mrf.mxu0  ;;  %v3121_v47 = vpop.f32.mrf.mxu1 }
 0x214   :  { %v3122_v49 = vadd.f32 %v3121_v47, %v3120_v45 }
 0x215   :  { %v1623_v58 = vpop.f32.mrf.mxu0  ;;  %v3123_v31 = vpop.f32.mrf.mxu1 }
 0x216   :  { %v4434_v24 = vadd.f32 %v3119_v12, %v1623_v58 }
 0x217   :  { %v1625_v36 = vpop.f32.mrf.mxu0  ;;  %v3124_v25 = vpop.f32.mrf.mxu1 }
 0x218   :  { %v3125_v38 = vadd.f32 %v3124_v25, %v3123_v31 }
 0x219   :  { %v1626_v39 = vpop.f32.mrf.mxu0  ;;  %v3126_v61 = vpop.f32.mrf.mxu1 }
 0x21a   :  { %v4436_v16 = vadd.f32 %v3122_v49, %v1626_v39 }
 0x21b   :  { %v1628_v57 = vpop.f32.mrf.mxu0  ;;  %v3127_v63 = vpop.f32.mrf.mxu1 }
 0x21c   :  { %v3128_v1 = vadd.f32 %v3127_v63, %v3126_v61 }
 0x21d   :  { %v1631_v26 = vpop.f32.mrf.mxu0 }
 0x21e   :  { %v4438_v0 = vadd.f32 %v3125_v38, %v1631_v26 }
 0x21f   :  { %v1633_v55 = vpop.f32.mrf.mxu0 }
 0x221   :  { %v1634_v60 = vpop.f32.mrf.mxu0 }
 0x222   :  { %v4440_v51 = vadd.f32 %v3128_v1, %v1634_v60 }
 0x223   :  { %v1636_v59 = vpop.f32.mrf.mxu0 }
 0x22e   :  { %v2264_v23 = vpop.f32.mrf.mxu0 }
 0x230   :  { %v2266_v43 = vpop.f32.mrf.mxu0 }
 0x232   :  { %v2268_v46 = vpop.f32.mrf.mxu0 }
 0x234   :  { %v2270_v37 = vpop.f32.mrf.mxu0 }
 0x236   :  { %v2274_v28 = vpop.f32.mrf.mxu0 }
 0x238   :  { %v2276_v29 = vpop.f32.mrf.mxu0 }
 0x23a   :  { %v2278_v19 = vpop.f32.mrf.mxu0 }
 0x23c   :  { %v2280_v52 = vpop.f32.mrf.mxu0 }
 0x23d   :  { %v2191_v54 = vpop.f32.mrf.mxu1 }
 0x23e   :  { %v2284_v2 = vpop.f32.mrf.mxu0  ;;  %v2265_v3 = vadd.f32 %v2264_v23, %v2191_v54 }
 0x23f   :  { %v2193_v18 = vpop.f32.mrf.mxu1 }
 0x240   :  { %v2286_v20 = vpop.f32.mrf.mxu0  ;;  %v2267_v21 = vadd.f32 %v2266_v43, %v2193_v18  ;;  %v2433_v30 = vmax.f32 %v4381_v56, %v2265_v3 }
 0x241   :  { %v2195_v8 = vpop.f32.mrf.mxu1 }
 0x242   :  { %v2288_v9 = vpop.f32.mrf.mxu0  ;;  %v2269_v35 = vadd.f32 %v2268_v46, %v2195_v8  ;;  %v2434_v41 = vmax.f32 %v4383_v4, %v2267_v21  ;;  %v2457_v47 = vmax.f32 %v2433_v30, 0.0 }
 0x243   :  { %v2197_v40 = vpop.f32.mrf.mxu1 }
 0x244   :  { %v2436_v12 = vmax.f32 %v4385_v7, %v2269_v35  ;;  %v2271_v22 = vadd.f32 %v2270_v37, %v2197_v40  ;;  %v2290_v45 = vpop.f32.mrf.mxu0  ;;  %v2458_v25 = vmax.f32 %v2434_v41, 0.0 }
 0x245   :  { %v2201_v33 = vpop.f32.mrf.mxu1 }
 0x246   :  { %v2460_v49 = vmax.f32 %v2436_v12, 0.0  ;;  %v2437_v58 = vmax.f32 %v4391_v10, %v2271_v22  ;;  %v2275_v31 = vadd.f32 %v2274_v28, %v2201_v33  ;;  %v2294_v61 = vpop.f32.mrf.mxu0 }
 0x247   :  { %v2203_v36 = vpop.f32.mrf.mxu1 }
 0x248   :  { %v2481_v38 = vpack.c.bf16 %v2460_v49, %v2457_v47  ;;  %v2461_v39 = vmax.f32 %v2437_v58, 0.0  ;;  %v2277_v56 = vadd.f32 %v2276_v29, %v2203_v36  ;;  %v2439_v63 = vmax.f32 %v4393_v42, %v2275_v31  ;;  %v2296_v55 = vpop.f32.mrf.mxu0 }
 0x249   :  { %v2205_v57 = vpop.f32.mrf.mxu1 }
 0x24a   :  { %v2279_v4 = vadd.f32 %v2278_v19, %v2205_v57  ;;  %v2482_v1 = vpack.c.bf16 %v2461_v39, %v2458_v25  ;;  %v2440_v26 = vmax.f32 %v4395_v13, %v2277_v56  ;;  %v2463_v23 = vmax.f32 %v2439_v63, 0.0  ;;  %v2298_v42 = vpop.f32.mrf.mxu0 }
 0x24b   :  { %v2207_v7 = vpop.f32.mrf.mxu1 }
 0x24c   :  { %v2442_v60 = vmax.f32 %v4400_v34, %v2279_v4  ;;  %v2281_v59 = vadd.f32 %v2280_v52, %v2207_v7  ;;  %2703 = vmatprep.mubr.bf16.mxu1 %v2482_v1  ;;  %v2464_v29 = vmax.f32 %v2440_v26, 0.0  ;;  %v2300_v8 = vpop.f32.mrf.mxu0 }
 0x24d   :  { %v2211_v10 = vpop.f32.mrf.mxu1  ;;  %2704 = vmatmul.mubr.bf16.vlgmr.msra.gmra.mxu1 %v2481_v38 }
 0x24e   :  { %v2466_v43 = vmax.f32 %v2442_v60, 0.0  ;;  %v2443_v46 = vmax.f32 %v4402_v53, %v2281_v59  ;;  %v2285_v37 = vadd.f32 %v2284_v2, %v2211_v10 }
 0x24f   :  { %v2213_v28 = vpop.f32.mrf.mxu1 }
 0x250   :  { %v2467_v19 = vmax.f32 %v2443_v46, 0.0  ;;  %v2287_v54 = vadd.f32 %v2286_v20, %v2213_v28  ;;  %v2484_v3 = vpack.c.bf16 %v2466_v43, %v2463_v23  ;;  %v2445_v13 = vmax.f32 %v4407_v32, %v2285_v37 }
 0x251   :  { %v2215_v18 = vpop.f32.mrf.mxu1 }
 0x252   :  { %v2289_v21 = vadd.f32 %v2288_v9, %v2215_v18  ;;  %v2485_v34 = vpack.c.bf16 %v2467_v19, %v2464_v29  ;;  %v2446_v30 = vmax.f32 %v4409_v15, %v2287_v54  ;;  %v2469_v2 = vmax.f32 %v2445_v13, 0.0 }
 0x253   :  { %v2217_v52 = vpop.f32.mrf.mxu1 }
 0x254   :  { %v2448_v35 = vmax.f32 %v4414_v17, %v2289_v21  ;;  %v2291_v40 = vadd.f32 %v2290_v45, %v2217_v52  ;;  %2711 = vmatprep.mubr.bf16.mxu1 %v2485_v34  ;;  %v2470_v32 = vmax.f32 %v2446_v30, 0.0 }
 0x255   :  { %v2221_v53 = vpop.f32.mrf.mxu1  ;;  %2712 = vmatmul.mubr.bf16.gmra.mxu1 %v2484_v3 }
 0x256   :  { %v2472_v41 = vmax.f32 %v2448_v35, 0.0  ;;  %v2449_v20 = vmax.f32 %v4416_v62, %v2291_v40  ;;  %v2295_v12 = vadd.f32 %v2294_v61, %v2221_v53 }
 0x257   :  { %v2402_v22 = vpop.f32.mrf.mxu0  ;;  %v2223_v33 = vpop.f32.mrf.mxu1 }
 0x258   :  { %v2473_v9 = vmax.f32 %v2449_v20, 0.0  ;;  %v2297_v47 = vadd.f32 %v2296_v55, %v2223_v33  ;;  %v2487_v58 = vpack.c.bf16 %v2472_v41, %v2469_v2  ;;  %v2451_v15 = vmax.f32 %v4418_v48, %v2295_v12 }
 0x259   :  { %v2404_v49 = vpop.f32.mrf.mxu0  ;;  %v2225_v31 = vpop.f32.mrf.mxu1 }
 0x25a   :  { %v2299_v17 = vadd.f32 %v2298_v42, %v2225_v31  ;;  %v2488_v36 = vpack.c.bf16 %v2473_v9, %v2470_v32  ;;  %v2452_v38 = vmax.f32 %v4420_v14, %v2297_v47  ;;  %v2475_v56 = vmax.f32 %v2451_v15, 0.0 }
 0x25b   :  { %v2405_v45 = vpop.f32.mrf.mxu0  ;;  %v2227_v25 = vpop.f32.mrf.mxu1 }
 0x25c   :  { %v2454_v39 = vmax.f32 %v4422_v50, %v2299_v17  ;;  %v2301_v62 = vadd.f32 %v2300_v8, %v2227_v25  ;;  %2719 = vmatprep.mubr.bf16.mxu1 %v2488_v36  ;;  %v2476_v7 = vmax.f32 %v2452_v38, 0.0 }
 0x25d   :  { %v2407_v61 = vpop.f32.mrf.mxu0  ;;  %2720 = vmatmul.mubr.bf16.gmra.mxu1 %v2487_v58 }
 0x25e   :  { %v2478_v57 = vmax.f32 %v2454_v39, 0.0  ;;  %v2455_v63 = vmax.f32 %v4424_v27, %v2301_v62  ;;  %v3145_v4 = vpop.f32.mrf.mxu1 }
 0x25f   :  { %v2410_v1 = vpop.f32.mrf.mxu0 }
 0x260   :  { %v2479_v48 = vmax.f32 %v2455_v63, 0.0  ;;  %v3146_v26 = vpop.f32.mrf.mxu1  ;;  %v2490_v60 = vpack.c.bf16 %v2478_v57, %v2475_v56 }
 0x261   :  { %v2412_v55 = vpop.f32.mrf.mxu0  ;;  %v3147_v59 = vadd.f32 %v3146_v26, %v3145_v4 }
 0x262   :  { %v3148_v10 = vpop.f32.mrf.mxu1  ;;  %v2491_v23 = vpack.c.bf16 %v2479_v48, %v2476_v7 }
 0x263   :  { %v2413_v14 = vpop.f32.mrf.mxu0  ;;  %v2403_v50 = vadd.f32 %v3147_v59, %v2402_v22 }
 0x264   :  { %v3149_v43 = vpop.f32.mrf.mxu1  ;;  %2727 = vmatprep.mubr.bf16.mxu1 %v2491_v23 }
 0x265   :  { %v2415_v46 = vpop.f32.mrf.mxu0  ;;  %v3150_v37 = vadd.f32 %v3149_v43, %v3148_v10  ;;  %2728 = vmatmul.mubr.bf16.gmra.mxu1 %v2490_v60  ;;  %v2435_v27 = vmax.f32 %v4426_v6, %v2403_v50 }
 0x266   :  { %v3151_v28 = vpop.f32.mrf.mxu1 }
 0x267   :  { %v2418_v29 = vpop.f32.mrf.mxu0  ;;  %v2406_v42 = vadd.f32 %v3150_v37, %v2405_v45  ;;  %v2459_v34 = vmax.f32 %v2435_v27, 0.0 }
 0x268   :  { %v3152_v19 = vpop.f32.mrf.mxu1 }
 0x269   :  { %v2420_v54 = vpop.f32.mrf.mxu0  ;;  %v2438_v3 = vmax.f32 %v4428_v5, %v2406_v42  ;;  %v3153_v18 = vadd.f32 %v3152_v19, %v3151_v28 }
 0x26a   :  { %v3154_v13 = vpop.f32.mrf.mxu1 }
 0x26b   :  { %v2421_v21 = vpop.f32.mrf.mxu0  ;;  %v2462_v52 = vmax.f32 %v2438_v3, 0.0  ;;  %v2411_v8 = vadd.f32 %v3153_v18, %v2410_v1 }
 0x26c   :  { %v3155_v30 = vpop.f32.mrf.mxu1 }
 0x26d   :  { %v2423_v35 = vpop.f32.mrf.mxu0  ;;  %v2483_v40 = vpack.c.bf16 %v2462_v52, %v2459_v34  ;;  %v3156_v53 = vadd.f32 %v3155_v30, %v3154_v13  ;;  %v2441_v6 = vmax.f32 %v4430_v11, %v2411_v8 }
 0x26e   :  { %v3157_v2 = vpop.f32.mrf.mxu1 }
 0x26f   :  { %v2426_v41 = vpop.f32.mrf.mxu0  ;;  %v2414_v20 = vadd.f32 %v3156_v53, %v2413_v14  ;;  %3225 = vmatprep.mubr.msk.bf16.mxu0 %vm2652_vm5, %v2483_v40  ;;  %v2465_v47 = vmax.f32 %v2441_v6, 0.0 }
 0x270   :  { %v3158_v12 = vpop.f32.mrf.mxu1 }
 0x271   :  { %v2428_v5 = vpop.f32.mrf.mxu0  ;;  %v2444_v22 = vmax.f32 %v4432_v44, %v2414_v20  ;;  %v3159_v33 = vadd.f32 %v3158_v12, %v3157_v2 }
 0x272   :  { %v3160_v32 = vpop.f32.mrf.mxu1 }
 0x273   :  { %v2429_v9 = vpop.f32.mrf.mxu0  ;;  %v2468_v49 = vmax.f32 %v2444_v22, 0.0  ;;  %v2419_v58 = vadd.f32 %v3159_v33, %v2418_v29 }
 0x274   :  { %v3161_v31 = vpop.f32.mrf.mxu1 }
 0x275   :  { %v2431_v15 = vpop.f32.mrf.mxu0  ;;  %v2486_v17 = vpack.c.bf16 %v2468_v49, %v2465_v47  ;;  %v3162_v45 = vadd.f32 %v3161_v31, %v3160_v32  ;;  %v2447_v11 = vmax.f32 %v4434_v24, %v2419_v58 }
 0x276   :  { %v3163_v36 = vpop.f32.mrf.mxu1 }
 0x277   :  { %v2422_v25 = vadd.f32 %v3162_v45, %v2421_v21  ;;  %3226 = vmatmul.mubr.msk.bf16.vlgmr.msra.gmra.mxu0 %vm2652_vm5, %v2486_v17  ;;  %v2471_v61 = vmax.f32 %v2447_v11, 0.0 }
 0x278   :  { %v3164_v38 = vpop.f32.mrf.mxu1 }
 0x279   :  { %v2450_v39 = vmax.f32 %v4436_v16, %v2422_v25  ;;  %v3165_v44 = vadd.f32 %v3164_v38, %v3163_v36 }
 0x27a   :  { %v3166_v62 = vpop.f32.mrf.mxu1 }
 0x27b   :  { %v2474_v56 = vmax.f32 %v2450_v39, 0.0  ;;  %v2427_v57 = vadd.f32 %v3165_v44, %v2426_v41 }
 0x27c   :  { %v3167_v63 = vpop.f32.mrf.mxu1 }
 0x27d   :  { %v2489_v4 = vpack.c.bf16 %v2474_v56, %v2471_v61  ;;  %v3168_v1 = vadd.f32 %v3167_v63, %v3166_v62  ;;  %v2453_v7 = vmax.f32 %v4438_v0, %v2427_v57 }
 0x27f   :  { %v2430_v48 = vadd.f32 %v3168_v1, %v2429_v9  ;;  %3229 = vmatprep.mubr.msk.bf16.mxu0 %vm2652_vm5, %v2489_v4  ;;  %v2477_v26 = vmax.f32 %v2453_v7, 0.0 }
 0x281   :  { %v2456_v24 = vmax.f32 %v4440_v51, %v2430_v48 }
 0x283   :  { %v2480_v55 = vmax.f32 %v2456_v24, 0.0 }
 0x285   :  { %v2492_v60 = vpack.c.bf16 %v2480_v55, %v2477_v26 }
 0x287   :  { %3230 = vmatmul.mubr.msk.bf16.gmra.mxu0 %vm2652_vm5, %v2492_v60 }
 0x30d   :  { %v3185_v16 = vpop.f32.mrf.mxu1 }
 0x30f   :  { %v3186_v59 = vpop.f32.mrf.mxu1 }
 0x310   :  { %v3187_v51 = vadd.f32 %v3186_v59, %v3185_v16 }
 0x311   :  { %v3188_v10 = vpop.f32.mrf.mxu1 }
 0x313   :  { %v3189_v14 = vpop.f32.mrf.mxu1 }
 0x314   :  { %v3190_v34 = vadd.f32 %v3189_v14, %v3188_v10 }
 0x315   :  { %v3191_v23 = vpop.f32.mrf.mxu1 }
 0x317   :  { %v3192_v50 = vpop.f32.mrf.mxu1 }
 0x318   :  { %v3193_v29 = vadd.f32 %v3192_v50, %v3191_v23 }
 0x319   :  { %v3194_v43 = vpop.f32.mrf.mxu1 }
 0x31b   :  { %v3195_v46 = vpop.f32.mrf.mxu1 }
 0x31c   :  { %v3196_v3 = vadd.f32 %v3195_v46, %v3194_v43 }
 0x31d   :  { %v3197_v37 = vpop.f32.mrf.mxu1 }
 0x31f   :  { %v3198_v0 = vpop.f32.mrf.mxu1 }
 0x320   :  { %v3199_v6 = vadd.f32 %v3198_v0, %v3197_v37 }
 0x321   :  { %v3200_v28 = vpop.f32.mrf.mxu1 }
 0x323   :  { %v3201_v27 = vpop.f32.mrf.mxu1 }
 0x324   :  { %v3202_v32 = vadd.f32 %v3201_v27, %v3200_v28 }
 0x325   :  { %v3203_v13 = vpop.f32.mrf.mxu1 }
 0x327   :  { %v3204_v35 = vpop.f32.mrf.mxu1 }
 0x328   :  { %v3205_v53 = vadd.f32 %v3204_v35, %v3203_v13 }
 0x329   :  { %v3206_v40 = vpop.f32.mrf.mxu1 }
 0x32b   :  { %v3207_v2 = vpop.f32.mrf.mxu1 }
 0x32c   :  { %v3208_v5 = vadd.f32 %v3207_v2, %v3206_v40 }
 0x337   :  { %v3227_v42 = vpop.f32.mrf.mxu0 }
 0x338   :  { %v2779_v19 = vadd.f32 %v3227_v42, %v3193_v29 }
 0x339   :  { %v2770_v54 = vpop.f32.mrf.mxu0 }
 0x33a   :  { %2804 = vst.msk [vmem:[%s4509_s7 + $0x10] sm:$0xff] %vm2801_vm6, %v2779_v19  ;;  %v2771_v18 = vadd.f32 %v3187_v51, %v2770_v54 }
 0x33b   :  { %v3228_v21 = vpop.f32.mrf.mxu0 }
 0x33c   :  { %2802 = vst.msk [vmem:[%s4509_s7] sm:$0xff] %vm2801_vm6, %v2771_v18  ;;  %v2782_v52 = vadd.f32 %v3228_v21, %v3196_v3 }
 0x33d   :  { %v2773_v8 = vpop.f32.mrf.mxu0 }
 0x33e   :  { %2805 = vst.msk [vmem:[%s4509_s7 + $0x18] sm:$0xff] %vm2801_vm6, %v2782_v52  ;;  %v2774_v30 = vadd.f32 %v3190_v34, %v2773_v8 }
 0x340   :  { %2803 = vst.msk [vmem:[%s4509_s7 + $0x8] sm:$0xff] %vm2801_vm6, %v2774_v30 }
 0x347   :  { %v3231_v41 = vpop.f32.mrf.mxu0 }
 0x348   :  { %v2795_v20 = vadd.f32 %v3231_v41, %v3205_v53 }
 0x349   :  { %v2786_v12 = vpop.f32.mrf.mxu0 }
 0x34a   :  { %2808 = vst.msk [vmem:[%s4509_s7 + $0x30] sm:$0xff] %vm2801_vm6, %v2795_v20  ;;  %v2787_v22 = vadd.f32 %v3199_v6, %v2786_v12 }
 0x34b   :  { %v3232_v33 = vpop.f32.mrf.mxu0 }
 0x34c   :  { %2806 = vst.msk [vmem:[%s4509_s7 + $0x20] sm:$0xff] %vm2801_vm6, %v2787_v22  ;;  %v2798_v9 = vadd.f32 %v3232_v33, %v3208_v5 }
 0x34d   :  { %v2789_v47 = vpop.f32.mrf.mxu0 }
 0x34e   :  { %2809 = vst.msk [vmem:[%s4509_s7 + $0x38] sm:$0xff] %vm2801_vm6, %v2798_v9  ;;  %v2790_v49 = vadd.f32 %v3202_v32, %v2789_v47 }
 0x350   :  { %2807 = vst.msk [vmem:[%s4509_s7 + $0x28] sm:$0xff] %vm2801_vm6, %v2790_v49 }
 0x351   :  { %2814 = vsyncpa [#allocation3], 1 }

</bundles_post_ra>
